<compile_context>
chip_gen: v7x
topology: tpu7x:2x2x1
jax: 0.10.0
libtpu: 0.0.40
codegen_flags: <defaults>
</compile_context>

<pallas_src>
import jax
import jax.numpy as jnp
import numpy as np
from jax.experimental import pallas as pl
from jax.experimental.pallas import tpu as pltpu

# ---- problem sizes (small, consistent with the module) ----
N, C_IN, C_OUT, T, V = 2, 4, 16, 8, 16
NUM_SUBSET = 3
COFF = 4
INTER = C_OUT // COFF            # unit_gcn embedding channels (= 4)
TCN_INNER = C_OUT // 2           # Temporal_SL inner channels, reduct_ratio = 2 (= 8)
KT, PAD = 9, 4                   # temporal window / padding (stride = 1)
EPS = 1e-5                       # BatchNorm eps

# MXU operand dtype: native bf16 on v5e/v6e/v7x (single-pass matmuls, half the weight
# bytes); accumulation stays f32 via preferred_element_type.
MXU_DTYPE = jnp.bfloat16

# derived lane widths / weight-slab row offsets (all static)
CIT = C_IN * T                   # 32
CT = C_OUT * T                   # 128
ICT = TCN_INNER * T              # 64
EW = INTER * T                   # 32  (embedding lane width per subset)
K_BIG = (1 + NUM_SUBSET) * CIT   # 128 (fused down + conv_d contraction size)
OFF_BIG = 0
OFF_D1 = OFF_BIG + K_BIG         # 128
OFF_P2 = OFF_D1 + CT             # 256
OFF_D2 = OFF_P2 + ICT            # 320
W128_ROWS = OFF_D2 + CT          # 448

# samples stacked per grid step (whole batch in one step for the test size)
B_BLOCK = N if N <= 8 else 8
assert N % B_BLOCK == 0


# =====================================================================
# Pallas kernel: one grid step = B_BLOCK samples, slab layout (B_BLOCK*V, C*T)
# =====================================================================
def tcn_gcn_kernel(x_ref, At_ref, wab_ref, abb_ref, w128_ref, p1_ref, shifts_ref, out_ref):
    f32 = jnp.float32

    def mm(a_mx, b_mx):  # MXU matmul, operands already in MXU dtype, f32 accumulation
        return jnp.dot(a_mx, b_mx, preferred_element_type=f32)

    def hardswish(u):
        return u * jnp.minimum(jnp.maximum(u + 3.0, 0.0), 6.0) * (1.0 / 6.0)

    x = x_ref[...]                                   # (M, CIT) f32, M = B_BLOCK*V
    x_mx = x.astype(MXU_DTYPE)                       # cast once, reused everywhere

    # ---------------- unit_gcn ----------------
    # one wide embedding matmul for all conv_a / conv_b (biases pre-packed per lane)
    ab = mm(x_mx, wab_ref[...]) + abb_ref[...]       # (M, 2*NUM_SUBSET*EW) = (M, 192)
    ab_mx = ab.astype(MXU_DTYPE)

    # per-sample attention (transposed form -> plain matmuls), stacked back on sublanes
    z_rows = []
    for n in range(B_BLOCK):
        r0 = n * V
        xs = x[r0:r0 + V, :]                         # (V, CIT) f32
        xs_mx = x_mx[r0:r0 + V, :]
        zs = [xs]
        for i in range(NUM_SUBSET):
            a1 = ab_mx[r0:r0 + V, i * EW:(i + 1) * EW]
            a2 = ab_mx[r0:r0 + V, (NUM_SUBSET + i) * EW:(NUM_SUBSET + i + 1) * EW]
            # s^T[w, v] = sum_j a2[w, j] * a1[v, j]; torch softmax(dim=-2) == last axis here
            sT = jax.lax.dot_general(a2, a1, (((1,), (1,)), ((), ())),
                                     preferred_element_type=f32) * (1.0 / EW)
            sT = sT - jnp.max(sT, axis=-1, keepdims=True)
            e = jnp.exp(sT)
            attnT = e * pl.reciprocal(jnp.sum(e, axis=-1, keepdims=True),
                                      approx=True) + At_ref[i]
            # zpre[w, (c,t)] = sum_v attn^T[w, v] * x[v, (c,t)]
            zs.append(mm(attnT.astype(MXU_DTYPE), xs_mx))          # (V, CIT)
        z_rows.append(jnp.concatenate(zs, axis=-1))                # (V, 4*CIT) = (V, 128)
    z = z_rows[0] if B_BLOCK == 1 else jnp.concatenate(z_rows, axis=0)   # (M, 128)

    # fused down-branch + 3x conv_d: one (M,128)x(128,128) pass (gcn/down BN pre-folded)
    y = mm(z.astype(MXU_DTYPE), w128_ref[OFF_BIG:OFF_BIG + K_BIG, :]) + shifts_ref[0:1, :]
    y = jnp.maximum(y, 0.0)                          # unit_gcn ReLU
    y_mx = y.astype(MXU_DTYPE)

    # ---------------- Temporal_SL (stride=1 -> identity residual) ----------------
    h = hardswish(mm(y_mx, w128_ref[OFF_D1:OFF_D1 + CT, :]) + shifts_ref[1:2, :])
    h = mm(h.astype(MXU_DTYPE), p1_ref[...])         # point_conv1 (its shift folded into p2's)
    h = hardswish(mm(h.astype(MXU_DTYPE), w128_ref[OFF_P2:OFF_P2 + ICT, :]) + shifts_ref[2:3, :])
    h = mm(h.astype(MXU_DTYPE), w128_ref[OFF_D2:OFF_D2 + CT, :]) + shifts_ref[3:4, :]
    out_ref[...] = jnp.maximum(h + y, 0.0)           # + identity residual, outer ReLU


# =====================================================================
# Glue: parameter re-blocking (plain JAX f32, exact math; cast to bf16 at the end)
# =====================================================================
def rep_t(v):
    """Per-channel (C,) -> per-(c,t) lane vector (C*T,), channel-major / time-minor."""
    return jnp.repeat(v, T)


def bn_scale_shift(bnp):
    """Inference BatchNorm (gamma, beta, mean, var) -> per-channel scale / shift."""
    g, b, m, v = bnp
    s = g / jnp.sqrt(v + EPS)
    return s, b - m * s


def kron_cols(w, col_scale=None):
    """(C_out, C_in) 1x1-conv weight -> (C_in*T, C_out*T) right-multiply block for the
    (rows, C*T) slab, optionally with a per-output-channel scale folded into the columns."""
    if col_scale is not None:
        w = w * col_scale[:, None]
    return jnp.kron(w.T, jnp.eye(T, dtype=w.dtype))


def dw_band(w, col_scale):
    """(C, KT) depthwise temporal filters (pad PAD, stride 1) -> (C*T, C*T) banded
    right-multiply block, per-channel BN scale folded into the columns."""
    ws = w * col_scale[:, None]
    c = w.shape[0]
    out = jnp.zeros((c * T, c * T), w.dtype)
    for k in range(KT):
        out = out + jnp.kron(jnp.diag(ws[:, k]), jnp.eye(T, k=PAD - k, dtype=w.dtype))
    return out


def build_kernel_args(p):
    s_gcn, sh_gcn = bn_scale_shift(p['gcn_bn'])
    s_dn, sh_dn = bn_scale_shift(p['down_bn'])
    s_d1, sh_d1 = bn_scale_shift(p['bn_d1'])
    s_p1, sh_p1 = bn_scale_shift(p['bn_p1'])
    s_p2, sh_p2 = bn_scale_shift(p['bn_p2'])
    s_d2, sh_d2 = bn_scale_shift(p['bn_d2'])

    # adjacency, pre-transposed per subset (attention is computed in transposed form)
    A_T = jnp.transpose(p['A'] + p['PA'], (0, 2, 1))

    # fused conv_a / conv_b embedding weight (32, 192) + fused per-lane bias row (1, 192)
    wab = jnp.concatenate([kron_cols(p['wa'][i]) for i in range(NUM_SUBSET)]
                          + [kron_cols(p['wb'][i]) for i in range(NUM_SUBSET)], axis=1)
    ab_bias = jnp.concatenate([rep_t(p['ba'][i]) for i in range(NUM_SUBSET)]
                              + [rep_t(p['bb'][i]) for i in range(NUM_SUBSET)])[None, :]

    # fused [down; conv_d0; conv_d1; conv_d2] (128, 128) with the BN scales folded in
    w_big = jnp.concatenate([kron_cols(p['wdown'], s_dn)]
                            + [kron_cols(p['wd'][i], s_gcn) for i in range(NUM_SUBSET)], axis=0)

    d1_band = dw_band(p['w_d1'], s_d1)               # (128, 128)
    d2_band = dw_band(p['w_d2'], s_d2)               # (128, 128)
    p1_blk = kron_cols(p['w_p1'], s_p1)              # (128, 64)
    p2_blk = kron_cols(p['w_p2'], s_p2)              # (64, 128)

    # one slab for every 128-lane weight: rows [w_big | d1_band | p2_blk | d2_band]
    w128 = jnp.concatenate([w_big, d1_band, p2_blk, d2_band], axis=0)    # (448, 128)
    assert w128.shape == (W128_ROWS, CT)

    # per-lane shift rows (conv biases + BN shifts pre-folded)
    gcn_shift = rep_t(s_gcn * jnp.sum(p['bd'], axis=0) + sh_gcn + s_dn * p['bdown'] + sh_dn)
    t1_shift = rep_t(s_d1 * p['b_d1'] + sh_d1)
    p1_shift = rep_t(s_p1 * p['b_p1'] + sh_p1)
    # point_conv1's shift folded through point_conv2 (both are linear up to the hardswish)
    p2_shift = p1_shift @ p2_blk + rep_t(s_p2 * p['b_p2'] + sh_p2)
    t2_shift = rep_t(s_d2 * p['b_d2'] + sh_d2)
    shifts = jnp.stack([gcn_shift, t1_shift, p2_shift, t2_shift])        # (4, 128)

    return (A_T, wab.astype(MXU_DTYPE), ab_bias, w128.astype(MXU_DTYPE),
            p1_blk.astype(MXU_DTYPE), shifts)


def tcn_gcn_unit_slab(x_slab, args):
    """(N*V, C_IN*T) slab -> (N*V, C_OUT*T) slab.  Keep this layout when chaining units
    to avoid per-layer HBM transposes."""
    rows = x_slab.shape[0]
    nb = rows // (B_BLOCK * V)

    def full_spec(a):
        nd = a.ndim
        return pl.BlockSpec(a.shape, lambda n, _nd=nd: (0,) * _nd)

    in_specs = ([pl.BlockSpec((B_BLOCK * V, CIT), lambda n: (n, 0))]
                + [full_spec(a) for a in args])

    return pl.pallas_call(
        tcn_gcn_kernel,
        out_shape=jax.ShapeDtypeStruct((rows, CT), jnp.float32),
        grid_spec=pltpu.PrefetchScalarGridSpec(
            num_scalar_prefetch=0,
            grid=(nb,),
            in_specs=in_specs,
            out_specs=pl.BlockSpec((B_BLOCK * V, CT), lambda n: (n, 0)),
        ),
        compiler_params=pltpu.CompilerParams(dimension_semantics=("parallel",)),
    )(x_slab, *args)


def tcn_gcn_unit(x_nctv, p):
    """x_nctv: (N, C_IN, T, V) float32 -> (N, C_OUT, T, V) float32."""
    # transposed lane-dense slab: (N*V, C_IN*T)
    x_slab = jnp.transpose(x_nctv.reshape(N, C_IN * T, V), (0, 2, 1)).reshape(N * V, CIT)
    args = build_kernel_args(p)
    out = tcn_gcn_unit_slab(x_slab, args)
    # (N*V, C_OUT*T) -> (N, C_OUT, T, V)
    return jnp.transpose(out.reshape(N, V, CT), (0, 2, 1)).reshape(N, C_OUT, T, V)


# =====================================================================
# Parameters (generic values so every folded path is exercised)
# =====================================================================
def init_params(key):
    keys = iter(jax.random.split(key, 48))
    nrm = lambda shape, std: std * jax.random.normal(next(keys), shape, jnp.float32)
    uni = lambda shape, lo, hi: jax.random.uniform(next(keys), shape, jnp.float32,
                                                   minval=lo, maxval=hi)

    def bn_params(c):
        # (gamma, beta, running_mean, running_var); generic values exercise the full BN fold.
        return (uni((c,), 0.8, 1.2), nrm((c,), 0.1), nrm((c,), 0.1), uni((c,), 0.8, 1.2))

    p = {}
    p['A'] = uni((NUM_SUBSET, V, V), 0.0, 1.0) / V
    p['PA'] = jnp.full((NUM_SUBSET, V, V), 1e-6, jnp.float32)
    p['wa'] = nrm((NUM_SUBSET, INTER, C_IN), 0.5)
    p['ba'] = nrm((NUM_SUBSET, INTER), 0.1)
    p['wb'] = nrm((NUM_SUBSET, INTER, C_IN), 0.5)
    p['bb'] = nrm((NUM_SUBSET, INTER), 0.1)
    p['wd'] = nrm((NUM_SUBSET, C_OUT, C_IN), float(np.sqrt(2.0 / (C_OUT * C_IN * NUM_SUBSET))))
    p['bd'] = nrm((NUM_SUBSET, C_OUT), 0.1)
    p['wdown'] = nrm((C_OUT, C_IN), 0.35)
    p['bdown'] = nrm((C_OUT,), 0.1)
    p['gcn_bn'] = bn_params(C_OUT)     # NOTE: module's bn_init uses gamma=1e-6; generic gamma
    p['down_bn'] = bn_params(C_OUT)    #       used here so the attention path is validated.
    p['w_d1'] = nrm((C_OUT, KT), 0.25)
    p['b_d1'] = nrm((C_OUT,), 0.1)
    p['bn_d1'] = bn_params(C_OUT)
    p['w_p1'] = nrm((TCN_INNER, C_OUT), 0.3)
    p['b_p1'] = nrm((TCN_INNER,), 0.1)
    p['bn_p1'] = bn_params(TCN_INNER)
    p['w_p2'] = nrm((C_OUT, TCN_INNER), 0.3)
    p['b_p2'] = nrm((C_OUT,), 0.1)
    p['bn_p2'] = bn_params(C_OUT)
    p['w_d2'] = nrm((C_OUT, KT), 0.25)
    p['b_d2'] = nrm((C_OUT,), 0.1)
    p['bn_d2'] = bn_params(C_OUT)
    return p


# =====================================================================
# Pure-JAX reference following the PyTorch forward literally
# =====================================================================
def reference(x, p):
    P = jax.lax.Precision.HIGHEST

    def conv1x1(xx, w, b):
        return jnp.einsum('oc,nctv->notv', w, xx, precision=P) + b[None, :, None, None]

    def dwconv9(xx, w, b):
        xp = jnp.pad(xx, ((0, 0), (0, 0), (PAD, PAD), (0, 0)))
        out = sum(w[None, :, k, None, None] * xp[:, :, k:k + T, :] for k in range(KT))
        return out + b[None, :, None, None]

    def bn(xx, bnp):
        g, bta, m, v = bnp
        s = (g / jnp.sqrt(v + EPS))[None, :, None, None]
        return (xx - m[None, :, None, None]) * s + bta[None, :, None, None]

    def hswish(u):
        return u * jnp.clip(u + 3.0, 0.0, 6.0) / 6.0

    A = p['A'] + p['PA']
    xflat = x.reshape(N, C_IN * T, V)
    y = 0.0
    for i in range(NUM_SUBSET):
        A1 = conv1x1(x, p['wa'][i], p['ba'][i])
        A1 = jnp.transpose(A1, (0, 3, 1, 2)).reshape(N, V, INTER * T)
        A2 = conv1x1(x, p['wb'][i], p['bb'][i]).reshape(N, INTER * T, V)
        S = jnp.matmul(A1, A2, precision=P) / float(INTER * T)
        S = jax.nn.softmax(S, axis=-2) + A[i]
        z = jnp.matmul(xflat, S, precision=P).reshape(N, C_IN, T, V)
        y = y + conv1x1(z, p['wd'][i], p['bd'][i])
    y = bn(y, p['gcn_bn']) + bn(conv1x1(x, p['wdown'], p['bdown']), p['down_bn'])
    y = jax.nn.relu(y)

    # Temporal_SL (stride=1, residual=True -> identity residual)
    res = y
    h = hswish(bn(dwconv9(y, p['w_d1'], p['b_d1']), p['bn_d1']))
    h = bn(conv1x1(h, p['w_p1'], p['b_p1']), p['bn_p1'])
    h = hswish(bn(conv1x1(h, p['w_p2'], p['b_p2']), p['bn_p2']))
    h = bn(dwconv9(h, p['w_d2'], p['b_d2']), p['bn_d2'])
    return jax.nn.relu(h + res)


if __name__ == "__main__":
    key = jax.random.PRNGKey(0)
    kx, kp = jax.random.split(key)
    x = jax.random.normal(kx, (N, C_IN, T, V), jnp.float32)
    p = init_params(kp)

    out = jax.jit(tcn_gcn_unit)(x, p)
    out = jax.block_until_ready(out)

    ref = reference(x, p)
    # bf16 MXU operands (f32 accumulation) + EUP approximate reciprocal in the softmax:
    # tolerance loosened from 1e-2 to 5e-2 per the performance review.
    np.testing.assert_allclose(np.asarray(out), np.asarray(ref), rtol=5e-2, atol=5e-2)
    print("KERNEL_OK")
</pallas_src>

<mosaic_0001>
module attributes {stable_mosaic.version = 11 : i64} {
  func.func @tcn_gcn_kernel(%arg0: i32, %arg1: memref<32x32xf32, #tpu.memory_space<vmem>>, %arg2: memref<3x16x16xf32, #tpu.memory_space<vmem>>, %arg3: memref<32x192xbf16, #tpu.memory_space<vmem>>, %arg4: memref<1x192xf32, #tpu.memory_space<vmem>>, %arg5: memref<448x128xbf16, #tpu.memory_space<vmem>>, %arg6: memref<128x64xbf16, #tpu.memory_space<vmem>>, %arg7: memref<4x128xf32, #tpu.memory_space<vmem>>, %arg8: memref<32x128xf32, #tpu.memory_space<vmem>>) attributes {dimension_semantics = [#tpu.dimension_semantics<parallel>], iteration_bounds = array<i64: 1>, scalar_prefetch = 0 : i64, scratch_operands = 0 : i64, tpu.core_type = #tpu.core_type<tc>, window_params = [{transform_indices = @transform_0, window_bounds = array<i64: 32, 32>}, {pipeline_mode = #tpu.pipeline_mode<synchronous>, transform_indices = @transform_1, window_bounds = array<i64: 3, 16, 16>}, {pipeline_mode = #tpu.pipeline_mode<synchronous>, transform_indices = @transform_2, window_bounds = array<i64: 32, 192>}, {pipeline_mode = #tpu.pipeline_mode<synchronous>, transform_indices = @transform_3, window_bounds = array<i64: 1, 192>}, {pipeline_mode = #tpu.pipeline_mode<synchronous>, transform_indices = @transform_4, window_bounds = array<i64: 448, 128>}, {pipeline_mode = #tpu.pipeline_mode<synchronous>, transform_indices = @transform_5, window_bounds = array<i64: 128, 64>}, {pipeline_mode = #tpu.pipeline_mode<synchronous>, transform_indices = @transform_6, window_bounds = array<i64: 4, 128>}, {transform_indices = @transform_7, window_bounds = array<i64: 32, 128>}]} {
    %c0 = arith.constant 0 : index
    %c0_0 = arith.constant 0 : index
    %0 = vector.load %arg1[%c0, %c0_0] : memref<32x32xf32, #tpu.memory_space<vmem>>, vector<32x32xf32>
    %1 = arith.truncf %0 : vector<32x32xf32> to vector<32x32xbf16>
    %c0_1 = arith.constant 0 : index
    %c0_2 = arith.constant 0 : index
    %2 = vector.load %arg3[%c0_1, %c0_2] : memref<32x192xbf16, #tpu.memory_space<vmem>>, vector<32x192xbf16>
    %cst = arith.constant dense<0.000000e+00> : vector<32x192xf32>
    %3 = tpu.matmul %1, %2, %cst {dimension_numbers = #tpu.dot_dimension_numbers<[1], [0], [0], [1], [0, 0, 1, 1], [], []>} : vector<32x32xbf16>, vector<32x192xbf16>, vector<32x192xf32> -> vector<32x192xf32>
    %c0_3 = arith.constant 0 : index
    %c0_4 = arith.constant 0 : index
    %4 = vector.load %arg4[%c0_3, %c0_4] : memref<1x192xf32, #tpu.memory_space<vmem>>, vector<1x192xf32>
    %5 = vector.broadcast %4 : vector<1x192xf32> to vector<32x192xf32>
    %6 = arith.addf %3, %5 : vector<32x192xf32>
    %7 = arith.truncf %6 : vector<32x192xf32> to vector<32x192xbf16>
    %8 = vector.extract_strided_slice %0 {offsets = [0, 0], sizes = [16, 32], strides = [1, 1]} : vector<32x32xf32> to vector<16x32xf32>
    %9 = vector.extract_strided_slice %1 {offsets = [0, 0], sizes = [16, 32], strides = [1, 1]} : vector<32x32xbf16> to vector<16x32xbf16>
    %10 = vector.extract_strided_slice %7 {offsets = [0, 0], sizes = [16, 32], strides = [1, 1]} : vector<32x192xbf16> to vector<16x32xbf16>
    %11 = vector.extract_strided_slice %7 {offsets = [0, 96], sizes = [16, 32], strides = [1, 1]} : vector<32x192xbf16> to vector<16x32xbf16>
    %cst_5 = arith.constant dense<0.000000e+00> : vector<16x16xf32>
    %12 = tpu.matmul %11, %10, %cst_5 {dimension_numbers = #tpu.dot_dimension_numbers<[1], [1], [0], [0], [0, 0, 1, 0], [], []>} : vector<16x32xbf16>, vector<16x32xbf16>, vector<16x16xf32> -> vector<16x16xf32>
    %cst_6 = arith.constant 3.125000e-02 : f32
    %13 = vector.broadcast %cst_6 : f32 to vector<16x16xf32>
    %14 = arith.mulf %12, %13 : vector<16x16xf32>
    %cst_7 = arith.constant dense<0xFF800000> : vector<16xf32>
    %15 = vector.multi_reduction <maximumf>, %14, %cst_7 [1] : vector<16x16xf32> to vector<16xf32>
    %16 = vector.shape_cast %15 : vector<16xf32> to vector<16x1xf32>
    %17 = vector.broadcast %16 : vector<16x1xf32> to vector<16x16xf32>
    %18 = arith.subf %14, %17 : vector<16x16xf32>
    %19 = math.exp %18 : vector<16x16xf32>
    %cst_8 = arith.constant dense<0.000000e+00> : vector<16xf32>
    %20 = vector.multi_reduction <add>, %19, %cst_8 [1] : vector<16x16xf32> to vector<16xf32>
    %21 = vector.shape_cast %20 : vector<16xf32> to vector<16x1xf32>
    %22 = tpu.reciprocal %21 {approx = true} : vector<16x1xf32> -> vector<16x1xf32>
    %23 = vector.broadcast %22 : vector<16x1xf32> to vector<16x16xf32>
    %24 = arith.mulf %19, %23 : vector<16x16xf32>
    %c0_9 = arith.constant 0 : index
    %c0_10 = arith.constant 0 : index
    %c0_11 = arith.constant 0 : index
    %25 = vector.load %arg2[%c0_9, %c0_10, %c0_11] : memref<3x16x16xf32, #tpu.memory_space<vmem>>, vector<1x16x16xf32>
    %26 = vector.shape_cast %25 : vector<1x16x16xf32> to vector<16x16xf32>
    %27 = arith.addf %24, %26 : vector<16x16xf32>
    %28 = arith.truncf %27 : vector<16x16xf32> to vector<16x16xbf16>
    %cst_12 = arith.constant dense<0.000000e+00> : vector<16x32xf32>
    %29 = tpu.matmul %28, %9, %cst_12 {dimension_numbers = #tpu.dot_dimension_numbers<[1], [0], [0], [1], [0, 0, 1, 1], [], []>} : vector<16x16xbf16>, vector<16x32xbf16>, vector<16x32xf32> -> vector<16x32xf32>
    %30 = vector.extract_strided_slice %7 {offsets = [0, 32], sizes = [16, 32], strides = [1, 1]} : vector<32x192xbf16> to vector<16x32xbf16>
    %31 = vector.extract_strided_slice %7 {offsets = [0, 128], sizes = [16, 32], strides = [1, 1]} : vector<32x192xbf16> to vector<16x32xbf16>
    %cst_13 = arith.constant dense<0.000000e+00> : vector<16x16xf32>
    %32 = tpu.matmul %31, %30, %cst_13 {dimension_numbers = #tpu.dot_dimension_numbers<[1], [1], [0], [0], [0, 0, 1, 0], [], []>} : vector<16x32xbf16>, vector<16x32xbf16>, vector<16x16xf32> -> vector<16x16xf32>
    %cst_14 = arith.constant 3.125000e-02 : f32
    %33 = vector.broadcast %cst_14 : f32 to vector<16x16xf32>
    %34 = arith.mulf %32, %33 : vector<16x16xf32>
    %cst_15 = arith.constant dense<0xFF800000> : vector<16xf32>
    %35 = vector.multi_reduction <maximumf>, %34, %cst_15 [1] : vector<16x16xf32> to vector<16xf32>
    %36 = vector.shape_cast %35 : vector<16xf32> to vector<16x1xf32>
    %37 = vector.broadcast %36 : vector<16x1xf32> to vector<16x16xf32>
    %38 = arith.subf %34, %37 : vector<16x16xf32>
    %39 = math.exp %38 : vector<16x16xf32>
    %cst_16 = arith.constant dense<0.000000e+00> : vector<16xf32>
    %40 = vector.multi_reduction <add>, %39, %cst_16 [1] : vector<16x16xf32> to vector<16xf32>
    %41 = vector.shape_cast %40 : vector<16xf32> to vector<16x1xf32>
    %42 = tpu.reciprocal %41 {approx = true} : vector<16x1xf32> -> vector<16x1xf32>
    %43 = vector.broadcast %42 : vector<16x1xf32> to vector<16x16xf32>
    %44 = arith.mulf %39, %43 : vector<16x16xf32>
    %c1 = arith.constant 1 : index
    %c0_17 = arith.constant 0 : index
    %c0_18 = arith.constant 0 : index
    %45 = vector.load %arg2[%c1, %c0_17, %c0_18] : memref<3x16x16xf32, #tpu.memory_space<vmem>>, vector<1x16x16xf32>
    %46 = vector.shape_cast %45 : vector<1x16x16xf32> to vector<16x16xf32>
    %47 = arith.addf %44, %46 : vector<16x16xf32>
    %48 = arith.truncf %47 : vector<16x16xf32> to vector<16x16xbf16>
    %cst_19 = arith.constant dense<0.000000e+00> : vector<16x32xf32>
    %49 = tpu.matmul %48, %9, %cst_19 {dimension_numbers = #tpu.dot_dimension_numbers<[1], [0], [0], [1], [0, 0, 1, 1], [], []>} : vector<16x16xbf16>, vector<16x32xbf16>, vector<16x32xf32> -> vector<16x32xf32>
    %50 = vector.extract_strided_slice %7 {offsets = [0, 64], sizes = [16, 32], strides = [1, 1]} : vector<32x192xbf16> to vector<16x32xbf16>
    %51 = vector.extract_strided_slice %7 {offsets = [0, 160], sizes = [16, 32], strides = [1, 1]} : vector<32x192xbf16> to vector<16x32xbf16>
    %cst_20 = arith.constant dense<0.000000e+00> : vector<16x16xf32>
    %52 = tpu.matmul %51, %50, %cst_20 {dimension_numbers = #tpu.dot_dimension_numbers<[1], [1], [0], [0], [0, 0, 1, 0], [], []>} : vector<16x32xbf16>, vector<16x32xbf16>, vector<16x16xf32> -> vector<16x16xf32>
    %cst_21 = arith.constant 3.125000e-02 : f32
    %53 = vector.broadcast %cst_21 : f32 to vector<16x16xf32>
    %54 = arith.mulf %52, %53 : vector<16x16xf32>
    %cst_22 = arith.constant dense<0xFF800000> : vector<16xf32>
    %55 = vector.multi_reduction <maximumf>, %54, %cst_22 [1] : vector<16x16xf32> to vector<16xf32>
    %56 = vector.shape_cast %55 : vector<16xf32> to vector<16x1xf32>
    %57 = vector.broadcast %56 : vector<16x1xf32> to vector<16x16xf32>
    %58 = arith.subf %54, %57 : vector<16x16xf32>
    %59 = math.exp %58 : vector<16x16xf32>
    %cst_23 = arith.constant dense<0.000000e+00> : vector<16xf32>
    %60 = vector.multi_reduction <add>, %59, %cst_23 [1] : vector<16x16xf32> to vector<16xf32>
    %61 = vector.shape_cast %60 : vector<16xf32> to vector<16x1xf32>
    %62 = tpu.reciprocal %61 {approx = true} : vector<16x1xf32> -> vector<16x1xf32>
    %63 = vector.broadcast %62 : vector<16x1xf32> to vector<16x16xf32>
    %64 = arith.mulf %59, %63 : vector<16x16xf32>
    %c2 = arith.constant 2 : index
    %c0_24 = arith.constant 0 : index
    %c0_25 = arith.constant 0 : index
    %65 = vector.load %arg2[%c2, %c0_24, %c0_25] : memref<3x16x16xf32, #tpu.memory_space<vmem>>, vector<1x16x16xf32>
    %66 = vector.shape_cast %65 : vector<1x16x16xf32> to vector<16x16xf32>
    %67 = arith.addf %64, %66 : vector<16x16xf32>
    %68 = arith.truncf %67 : vector<16x16xf32> to vector<16x16xbf16>
    %cst_26 = arith.constant dense<0.000000e+00> : vector<16x32xf32>
    %69 = tpu.matmul %68, %9, %cst_26 {dimension_numbers = #tpu.dot_dimension_numbers<[1], [0], [0], [1], [0, 0, 1, 1], [], []>} : vector<16x16xbf16>, vector<16x32xbf16>, vector<16x32xf32> -> vector<16x32xf32>
    %70 = tpu.concatenate %8, %29, %49, %69 in 1 : vector<16x32xf32>, vector<16x32xf32>, vector<16x32xf32>, vector<16x32xf32> -> vector<16x128xf32>
    %71 = vector.extract_strided_slice %0 {offsets = [16, 0], sizes = [16, 32], strides = [1, 1]} : vector<32x32xf32> to vector<16x32xf32>
    %72 = vector.extract_strided_slice %1 {offsets = [16, 0], sizes = [16, 32], strides = [1, 1]} : vector<32x32xbf16> to vector<16x32xbf16>
    %73 = vector.extract_strided_slice %7 {offsets = [16, 0], sizes = [16, 32], strides = [1, 1]} : vector<32x192xbf16> to vector<16x32xbf16>
    %74 = vector.extract_strided_slice %7 {offsets = [16, 96], sizes = [16, 32], strides = [1, 1]} : vector<32x192xbf16> to vector<16x32xbf16>
    %cst_27 = arith.constant dense<0.000000e+00> : vector<16x16xf32>
    %75 = tpu.matmul %74, %73, %cst_27 {dimension_numbers = #tpu.dot_dimension_numbers<[1], [1], [0], [0], [0, 0, 1, 0], [], []>} : vector<16x32xbf16>, vector<16x32xbf16>, vector<16x16xf32> -> vector<16x16xf32>
    %cst_28 = arith.constant 3.125000e-02 : f32
    %76 = vector.broadcast %cst_28 : f32 to vector<16x16xf32>
    %77 = arith.mulf %75, %76 : vector<16x16xf32>
    %cst_29 = arith.constant dense<0xFF800000> : vector<16xf32>
    %78 = vector.multi_reduction <maximumf>, %77, %cst_29 [1] : vector<16x16xf32> to vector<16xf32>
    %79 = vector.shape_cast %78 : vector<16xf32> to vector<16x1xf32>
    %80 = vector.broadcast %79 : vector<16x1xf32> to vector<16x16xf32>
    %81 = arith.subf %77, %80 : vector<16x16xf32>
    %82 = math.exp %81 : vector<16x16xf32>
    %cst_30 = arith.constant dense<0.000000e+00> : vector<16xf32>
    %83 = vector.multi_reduction <add>, %82, %cst_30 [1] : vector<16x16xf32> to vector<16xf32>
    %84 = vector.shape_cast %83 : vector<16xf32> to vector<16x1xf32>
    %85 = tpu.reciprocal %84 {approx = true} : vector<16x1xf32> -> vector<16x1xf32>
    %86 = vector.broadcast %85 : vector<16x1xf32> to vector<16x16xf32>
    %87 = arith.mulf %82, %86 : vector<16x16xf32>
    %c0_31 = arith.constant 0 : index
    %c0_32 = arith.constant 0 : index
    %c0_33 = arith.constant 0 : index
    %88 = vector.load %arg2[%c0_31, %c0_32, %c0_33] : memref<3x16x16xf32, #tpu.memory_space<vmem>>, vector<1x16x16xf32>
    %89 = vector.shape_cast %88 : vector<1x16x16xf32> to vector<16x16xf32>
    %90 = arith.addf %87, %89 : vector<16x16xf32>
    %91 = arith.truncf %90 : vector<16x16xf32> to vector<16x16xbf16>
    %cst_34 = arith.constant dense<0.000000e+00> : vector<16x32xf32>
    %92 = tpu.matmul %91, %72, %cst_34 {dimension_numbers = #tpu.dot_dimension_numbers<[1], [0], [0], [1], [0, 0, 1, 1], [], []>} : vector<16x16xbf16>, vector<16x32xbf16>, vector<16x32xf32> -> vector<16x32xf32>
    %93 = vector.extract_strided_slice %7 {offsets = [16, 32], sizes = [16, 32], strides = [1, 1]} : vector<32x192xbf16> to vector<16x32xbf16>
    %94 = vector.extract_strided_slice %7 {offsets = [16, 128], sizes = [16, 32], strides = [1, 1]} : vector<32x192xbf16> to vector<16x32xbf16>
    %cst_35 = arith.constant dense<0.000000e+00> : vector<16x16xf32>
    %95 = tpu.matmul %94, %93, %cst_35 {dimension_numbers = #tpu.dot_dimension_numbers<[1], [1], [0], [0], [0, 0, 1, 0], [], []>} : vector<16x32xbf16>, vector<16x32xbf16>, vector<16x16xf32> -> vector<16x16xf32>
    %cst_36 = arith.constant 3.125000e-02 : f32
    %96 = vector.broadcast %cst_36 : f32 to vector<16x16xf32>
    %97 = arith.mulf %95, %96 : vector<16x16xf32>
    %cst_37 = arith.constant dense<0xFF800000> : vector<16xf32>
    %98 = vector.multi_reduction <maximumf>, %97, %cst_37 [1] : vector<16x16xf32> to vector<16xf32>
    %99 = vector.shape_cast %98 : vector<16xf32> to vector<16x1xf32>
    %100 = vector.broadcast %99 : vector<16x1xf32> to vector<16x16xf32>
    %101 = arith.subf %97, %100 : vector<16x16xf32>
    %102 = math.exp %101 : vector<16x16xf32>
    %cst_38 = arith.constant dense<0.000000e+00> : vector<16xf32>
    %103 = vector.multi_reduction <add>, %102, %cst_38 [1] : vector<16x16xf32> to vector<16xf32>
    %104 = vector.shape_cast %103 : vector<16xf32> to vector<16x1xf32>
    %105 = tpu.reciprocal %104 {approx = true} : vector<16x1xf32> -> vector<16x1xf32>
    %106 = vector.broadcast %105 : vector<16x1xf32> to vector<16x16xf32>
    %107 = arith.mulf %102, %106 : vector<16x16xf32>
    %c1_39 = arith.constant 1 : index
    %c0_40 = arith.constant 0 : index
    %c0_41 = arith.constant 0 : index
    %108 = vector.load %arg2[%c1_39, %c0_40, %c0_41] : memref<3x16x16xf32, #tpu.memory_space<vmem>>, vector<1x16x16xf32>
    %109 = vector.shape_cast %108 : vector<1x16x16xf32> to vector<16x16xf32>
    %110 = arith.addf %107, %109 : vector<16x16xf32>
    %111 = arith.truncf %110 : vector<16x16xf32> to vector<16x16xbf16>
    %cst_42 = arith.constant dense<0.000000e+00> : vector<16x32xf32>
    %112 = tpu.matmul %111, %72, %cst_42 {dimension_numbers = #tpu.dot_dimension_numbers<[1], [0], [0], [1], [0, 0, 1, 1], [], []>} : vector<16x16xbf16>, vector<16x32xbf16>, vector<16x32xf32> -> vector<16x32xf32>
    %113 = vector.extract_strided_slice %7 {offsets = [16, 64], sizes = [16, 32], strides = [1, 1]} : vector<32x192xbf16> to vector<16x32xbf16>
    %114 = vector.extract_strided_slice %7 {offsets = [16, 160], sizes = [16, 32], strides = [1, 1]} : vector<32x192xbf16> to vector<16x32xbf16>
    %cst_43 = arith.constant dense<0.000000e+00> : vector<16x16xf32>
    %115 = tpu.matmul %114, %113, %cst_43 {dimension_numbers = #tpu.dot_dimension_numbers<[1], [1], [0], [0], [0, 0, 1, 0], [], []>} : vector<16x32xbf16>, vector<16x32xbf16>, vector<16x16xf32> -> vector<16x16xf32>
    %cst_44 = arith.constant 3.125000e-02 : f32
    %116 = vector.broadcast %cst_44 : f32 to vector<16x16xf32>
    %117 = arith.mulf %115, %116 : vector<16x16xf32>
    %cst_45 = arith.constant dense<0xFF800000> : vector<16xf32>
    %118 = vector.multi_reduction <maximumf>, %117, %cst_45 [1] : vector<16x16xf32> to vector<16xf32>
    %119 = vector.shape_cast %118 : vector<16xf32> to vector<16x1xf32>
    %120 = vector.broadcast %119 : vector<16x1xf32> to vector<16x16xf32>
    %121 = arith.subf %117, %120 : vector<16x16xf32>
    %122 = math.exp %121 : vector<16x16xf32>
    %cst_46 = arith.constant dense<0.000000e+00> : vector<16xf32>
    %123 = vector.multi_reduction <add>, %122, %cst_46 [1] : vector<16x16xf32> to vector<16xf32>
    %124 = vector.shape_cast %123 : vector<16xf32> to vector<16x1xf32>
    %125 = tpu.reciprocal %124 {approx = true} : vector<16x1xf32> -> vector<16x1xf32>
    %126 = vector.broadcast %125 : vector<16x1xf32> to vector<16x16xf32>
    %127 = arith.mulf %122, %126 : vector<16x16xf32>
    %c2_47 = arith.constant 2 : index
    %c0_48 = arith.constant 0 : index
    %c0_49 = arith.constant 0 : index
    %128 = vector.load %arg2[%c2_47, %c0_48, %c0_49] : memref<3x16x16xf32, #tpu.memory_space<vmem>>, vector<1x16x16xf32>
    %129 = vector.shape_cast %128 : vector<1x16x16xf32> to vector<16x16xf32>
    %130 = arith.addf %127, %129 : vector<16x16xf32>
    %131 = arith.truncf %130 : vector<16x16xf32> to vector<16x16xbf16>
    %cst_50 = arith.constant dense<0.000000e+00> : vector<16x32xf32>
    %132 = tpu.matmul %131, %72, %cst_50 {dimension_numbers = #tpu.dot_dimension_numbers<[1], [0], [0], [1], [0, 0, 1, 1], [], []>} : vector<16x16xbf16>, vector<16x32xbf16>, vector<16x32xf32> -> vector<16x32xf32>
    %133 = tpu.concatenate %71, %92, %112, %132 in 1 : vector<16x32xf32>, vector<16x32xf32>, vector<16x32xf32>, vector<16x32xf32> -> vector<16x128xf32>
    %134 = tpu.concatenate %70, %133 in 0 : vector<16x128xf32>, vector<16x128xf32> -> vector<32x128xf32>
    %135 = arith.truncf %134 : vector<32x128xf32> to vector<32x128xbf16>
    %c0_51 = arith.constant 0 : index
    %c0_52 = arith.constant 0 : index
    %136 = vector.load %arg5[%c0_51, %c0_52] : memref<448x128xbf16, #tpu.memory_space<vmem>>, vector<128x128xbf16>
    %cst_53 = arith.constant dense<0.000000e+00> : vector<32x128xf32>
    %137 = tpu.matmul %135, %136, %cst_53 {dimension_numbers = #tpu.dot_dimension_numbers<[1], [0], [0], [1], [0, 0, 1, 1], [], []>} : vector<32x128xbf16>, vector<128x128xbf16>, vector<32x128xf32> -> vector<32x128xf32>
    %c0_54 = arith.constant 0 : index
    %c0_55 = arith.constant 0 : index
    %138 = vector.load %arg7[%c0_54, %c0_55] : memref<4x128xf32, #tpu.memory_space<vmem>>, vector<1x128xf32>
    %139 = vector.broadcast %138 : vector<1x128xf32> to vector<32x128xf32>
    %140 = arith.addf %137, %139 : vector<32x128xf32>
    %cst_56 = arith.constant 0.000000e+00 : f32
    %141 = vector.broadcast %cst_56 : f32 to vector<32x128xf32>
    %142 = arith.maximumf %140, %141 : vector<32x128xf32>
    %143 = arith.truncf %142 : vector<32x128xf32> to vector<32x128xbf16>
    %c128 = arith.constant 128 : index
    %c0_57 = arith.constant 0 : index
    %144 = vector.load %arg5[%c128, %c0_57] : memref<448x128xbf16, #tpu.memory_space<vmem>>, vector<128x128xbf16>
    %cst_58 = arith.constant dense<0.000000e+00> : vector<32x128xf32>
    %145 = tpu.matmul %143, %144, %cst_58 {dimension_numbers = #tpu.dot_dimension_numbers<[1], [0], [0], [1], [0, 0, 1, 1], [], []>} : vector<32x128xbf16>, vector<128x128xbf16>, vector<32x128xf32> -> vector<32x128xf32>
    %c1_59 = arith.constant 1 : index
    %c0_60 = arith.constant 0 : index
    %146 = vector.load %arg7[%c1_59, %c0_60] : memref<4x128xf32, #tpu.memory_space<vmem>>, vector<1x128xf32>
    %147 = vector.broadcast %146 : vector<1x128xf32> to vector<32x128xf32>
    %148 = arith.addf %145, %147 : vector<32x128xf32>
    %cst_61 = arith.constant 3.000000e+00 : f32
    %149 = vector.broadcast %cst_61 : f32 to vector<32x128xf32>
    %150 = arith.addf %148, %149 : vector<32x128xf32>
    %cst_62 = arith.constant 0.000000e+00 : f32
    %151 = vector.broadcast %cst_62 : f32 to vector<32x128xf32>
    %152 = arith.maximumf %150, %151 : vector<32x128xf32>
    %cst_63 = arith.constant 6.000000e+00 : f32
    %153 = vector.broadcast %cst_63 : f32 to vector<32x128xf32>
    %154 = arith.minimumf %152, %153 : vector<32x128xf32>
    %155 = arith.mulf %148, %154 : vector<32x128xf32>
    %cst_64 = arith.constant 0.166666672 : f32
    %156 = vector.broadcast %cst_64 : f32 to vector<32x128xf32>
    %157 = arith.mulf %155, %156 : vector<32x128xf32>
    %158 = arith.truncf %157 : vector<32x128xf32> to vector<32x128xbf16>
    %c0_65 = arith.constant 0 : index
    %c0_66 = arith.constant 0 : index
    %159 = vector.load %arg6[%c0_65, %c0_66] : memref<128x64xbf16, #tpu.memory_space<vmem>>, vector<128x64xbf16>
    %cst_67 = arith.constant dense<0.000000e+00> : vector<32x64xf32>
    %160 = tpu.matmul %158, %159, %cst_67 {dimension_numbers = #tpu.dot_dimension_numbers<[1], [0], [0], [1], [0, 0, 1, 1], [], []>} : vector<32x128xbf16>, vector<128x64xbf16>, vector<32x64xf32> -> vector<32x64xf32>
    %161 = arith.truncf %160 : vector<32x64xf32> to vector<32x64xbf16>
    %c256 = arith.constant 256 : index
    %c0_68 = arith.constant 0 : index
    %162 = vector.load %arg5[%c256, %c0_68] : memref<448x128xbf16, #tpu.memory_space<vmem>>, vector<64x128xbf16>
    %cst_69 = arith.constant dense<0.000000e+00> : vector<32x128xf32>
    %163 = tpu.matmul %161, %162, %cst_69 {dimension_numbers = #tpu.dot_dimension_numbers<[1], [0], [0], [1], [0, 0, 1, 1], [], []>} : vector<32x64xbf16>, vector<64x128xbf16>, vector<32x128xf32> -> vector<32x128xf32>
    %c2_70 = arith.constant 2 : index
    %c0_71 = arith.constant 0 : index
    %164 = vector.load %arg7[%c2_70, %c0_71] : memref<4x128xf32, #tpu.memory_space<vmem>>, vector<1x128xf32>
    %165 = vector.broadcast %164 : vector<1x128xf32> to vector<32x128xf32>
    %166 = arith.addf %163, %165 : vector<32x128xf32>
    %cst_72 = arith.constant 3.000000e+00 : f32
    %167 = vector.broadcast %cst_72 : f32 to vector<32x128xf32>
    %168 = arith.addf %166, %167 : vector<32x128xf32>
    %cst_73 = arith.constant 0.000000e+00 : f32
    %169 = vector.broadcast %cst_73 : f32 to vector<32x128xf32>
    %170 = arith.maximumf %168, %169 : vector<32x128xf32>
    %cst_74 = arith.constant 6.000000e+00 : f32
    %171 = vector.broadcast %cst_74 : f32 to vector<32x128xf32>
    %172 = arith.minimumf %170, %171 : vector<32x128xf32>
    %173 = arith.mulf %166, %172 : vector<32x128xf32>
    %cst_75 = arith.constant 0.166666672 : f32
    %174 = vector.broadcast %cst_75 : f32 to vector<32x128xf32>
    %175 = arith.mulf %173, %174 : vector<32x128xf32>
    %176 = arith.truncf %175 : vector<32x128xf32> to vector<32x128xbf16>
    %c320 = arith.constant 320 : index
    %c0_76 = arith.constant 0 : index
    %177 = vector.load %arg5[%c320, %c0_76] : memref<448x128xbf16, #tpu.memory_space<vmem>>, vector<128x128xbf16>
    %cst_77 = arith.constant dense<0.000000e+00> : vector<32x128xf32>
    %178 = tpu.matmul %176, %177, %cst_77 {dimension_numbers = #tpu.dot_dimension_numbers<[1], [0], [0], [1], [0, 0, 1, 1], [], []>} : vector<32x128xbf16>, vector<128x128xbf16>, vector<32x128xf32> -> vector<32x128xf32>
    %c3 = arith.constant 3 : index
    %c0_78 = arith.constant 0 : index
    %179 = vector.load %arg7[%c3, %c0_78] : memref<4x128xf32, #tpu.memory_space<vmem>>, vector<1x128xf32>
    %180 = vector.broadcast %179 : vector<1x128xf32> to vector<32x128xf32>
    %181 = arith.addf %178, %180 : vector<32x128xf32>
    %182 = arith.addf %181, %142 : vector<32x128xf32>
    %cst_79 = arith.constant 0.000000e+00 : f32
    %183 = vector.broadcast %cst_79 : f32 to vector<32x128xf32>
    %184 = arith.maximumf %182, %183 : vector<32x128xf32>
    %c0_80 = arith.constant 0 : index
    %c0_81 = arith.constant 0 : index
    %185 = vector.load %arg8[%c0_80, %c0_81] : memref<32x128xf32, #tpu.memory_space<vmem>>, vector<32x128xf32>
    tpu.vector_store %arg8[%c0_80, %c0_81], %184 {strides = array<i32>} : memref<32x128xf32, #tpu.memory_space<vmem>>, vector<32x128xf32>,
    return
  }
  func.func @transform_0(%arg0: i32) -> (i32, i32) {
    %c0_i32 = arith.constant 0 : i32
    %c0_i32_0 = arith.constant 0 : i32
    return %arg0, %c0_i32 : i32, i32
  }
  func.func @transform_1(%arg0: i32) -> (i32, i32, i32) {
    %c0_i32 = arith.constant 0 : i32
    %c0_i32_0 = arith.constant 0 : i32
    %c0_i32_1 = arith.constant 0 : i32
    %c0_i32_2 = arith.constant 0 : i32
    return %c0_i32, %c0_i32_0, %c0_i32_1 : i32, i32, i32
  }
  func.func @transform_2(%arg0: i32) -> (i32, i32) {
    %c0_i32 = arith.constant 0 : i32
    %c0_i32_0 = arith.constant 0 : i32
    %c0_i32_1 = arith.constant 0 : i32
    return %c0_i32, %c0_i32_0 : i32, i32
  }
  func.func @transform_3(%arg0: i32) -> (i32, i32) {
    %c0_i32 = arith.constant 0 : i32
    %c0_i32_0 = arith.constant 0 : i32
    %c0_i32_1 = arith.constant 0 : i32
    return %c0_i32, %c0_i32_0 : i32, i32
  }
  func.func @transform_4(%arg0: i32) -> (i32, i32) {
    %c0_i32 = arith.constant 0 : i32
    %c0_i32_0 = arith.constant 0 : i32
    %c0_i32_1 = arith.constant 0 : i32
    return %c0_i32, %c0_i32_0 : i32, i32
  }
  func.func @transform_5(%arg0: i32) -> (i32, i32) {
    %c0_i32 = arith.constant 0 : i32
    %c0_i32_0 = arith.constant 0 : i32
    %c0_i32_1 = arith.constant 0 : i32
    return %c0_i32, %c0_i32_0 : i32, i32
  }
  func.func @transform_6(%arg0: i32) -> (i32, i32) {
    %c0_i32 = arith.constant 0 : i32
    %c0_i32_0 = arith.constant 0 : i32
    %c0_i32_1 = arith.constant 0 : i32
    return %c0_i32, %c0_i32_0 : i32, i32
  }
  func.func @transform_7(%arg0: i32) -> (i32, i32) {
    %c0_i32 = arith.constant 0 : i32
    %c0_i32_0 = arith.constant 0 : i32
    return %arg0, %c0_i32 : i32, i32
  }
}

</mosaic_0001>

<bundles_post_ra>
// kernel: tcn_gcn_unit.1
= control target key start
LH: loop header
LB: loop body
LE: loop exit
PB: predicated region body
PF: predicated region fallthrough
CT: control target
= control target key end

     0   :  { %v1985_v1 = vmov 0   ;;  %vm69_vm0 = vcmask 261120   ;;  %v1986_v11 = vmov 0.0   ;;  %vm1987_vm1 = vmmov 0   ;;  %s1988_s17 = smov 64   ;;  %s1989_s18 = smov 32   ;;  %s2456_s2 = inlined_call_operand.vmem [shape: bf16[32,192], index: 2, kind: input, shape index: {}]   ;;  %s2457_s0 = inlined_call_operand.vmem [shape: f32[32,32], index: 0, kind: input, shape index: {}]   ;;  %s2458_s3 = inlined_call_operand.vmem [shape: f32[1,192], index: 3, kind: input, shape index: {}]   ;;  %s2459_s1 = inlined_call_operand.vmem [shape: f32[3,16,16], index: 1, kind: input, shape index: {}]   ;;  %s2460_s4 = inlined_call_operand.vmem [shape: bf16[448,128], index: 4, kind: input, shape index: {}]   ;;  %s2461_s5 = inlined_call_operand.vmem [shape: bf16[128,64], index: 5, kind: input, shape index: {}]   ;;  %s2462_s6 = inlined_call_operand.vmem [shape: f32[4,128], index: 6, kind: input, shape index: {}]   ;;  %s2463_s7 = inlined_call_operand.vmem [shape: f32[32,128], index: 7, kind: output, shape index: {}]  }
   0x1   :  { %v1895_v0 = vld [vmem:[%s2456_s2 + $0x4] ss:$8 sps:$4 sm:$0xff]   ;;  %108 = vmatprep.mubr.bf16.mxu0 %v1985_v1  ;;  %v1897_v2 = vld [vmem:[%s2456_s2] ss:$8 sps:$4 sm:$0xff]   ;;  %v1898_v3 = vld [vmem:[%s2456_s2 + $0x14] ss:$8 sps:$4 sm:$0xff]   ;;  %1701 = vmatprep.subr.bf16.mxu1 %v1986_v11  ;;  %v39_v12 = vlaneseq }
   0x2   :  { %76 = vmatprep.subr.bf16.mxu0 %v1895_v0  ;;  %v1900_v4 = vld [vmem:[%s2456_s2 + $0x10] ss:$8 sps:$4 sm:$0xff]   ;;  %v2046_v5 = vld [vmem:[%s2457_s0] sm:$0xff]  ;;  %v2051_v6 = vld [vmem:[%s2457_s0 + $0x8] sm:$0xff]  ;;  %1703 = vmatprep.mubr.msk.bf16.mxu1 %vm1987_vm1, %v1986_v11  ;;  %vm185_vm2 = vcmask 130048   ;;  %vm532_vm3 = vcmask 523264  }
   0x3   :  { %77 = vmatpush1.bf16.msra.mxu0 %v1897_v2  ;;  %v2055_v7 = vpack.c.bf16 %v2051_v6, %v2046_v5  ;;  %v2062_v8 = vld [vmem:[%s2457_s0 + $0x10] sm:$0xff]  ;;  %v2067_v9 = vld [vmem:[%s2457_s0 + $0x18] sm:$0xff]  ;;  %v40_v13 = vshrl.u32 %v39_v12, 7  ;;  %v37_v15 = vld [vmem:[%s2458_s3] sm:$0x3]  ;;  %s1990_s3 = smov 96  }
   0x4   :  { %78 = vmatprep.subr.bf16.mxu0 %v1898_v3  ;;  %v2071_v10 = vpack.c.bf16 %v2067_v9, %v2062_v8  ;;  %vm535_vm4 = vcmask 785408  }
   0x5   :  { %1702 = vmatpush3.bf16.msra.mxu1 %v2055_v7  ;;  %v41_v14 = vsub.s32 0, %v40_v13  ;;  %v45_v16 = vsub.s32 1, %v40_v13 }
   0x6   :  { %1713 = vmatprep.subr.bf16.mxu1 %v1986_v11 }
   0x7   :  { %79 = vmatpush1.bf16.msra.mxu0 %v1900_v4  ;;  %v42_v17 = vrot.slane %v37_v15, %v41_v14  ;;  %v46_v19 = vrot.slane %v37_v15, %v45_v16 }
   0x8   :  { %1695 = vmatprep.subr.bf16.mxu0 %v1986_v11 }
   0xa   :  { %1565 = vmatmul.mubr.msk.bf16.vlgmr.msra.gmra.mrb[0].mxu0 %vm69_vm0, %v2055_v7 }
   0xb   :  { %118 = vmatprep.mubr.bf16.mxu0 %v1985_v1 }
  0x12   :  { %1566 = vmatmul.mubr.msk.bf16.gmra.mrb[4].mxu0 %vm69_vm0, %v2071_v10 }
  0x13   :  { %1697 = vmatprep.mubr.msk.bf16.mxu0 %vm1987_vm1, %v1986_v11 }
  0xdd   :  { %v110_v18 = vpop.f32.mrb[0].mxu0 }
  0xde   :  { %v112_v20 = vpop.f32.mrb[1].mxu0  ;;  %v111_v22 = vadd.f32 %v110_v18, %v42_v17 }
  0xdf   :  { %v114_v21 = vpop.f32.mrb[2].mxu0  ;;  %v113_v25 = vadd.f32 %v112_v20, %v46_v19 }
  0xe0   :  { %v115_v23 = vadd.f32 %v114_v21, %v42_v17  ;;  %v116_v24 = vpop.f32.mrb[3].mxu0 }
  0xe1   :  { %v117_v26 = vadd.f32 %v116_v24, %v46_v19 }
  0xe2   :  { %v129_v27 = vpack.c.bf16 %v115_v23, %v111_v22 }
  0xe3   :  { %v130_v28 = vpack.c.bf16 %v117_v26, %v113_v25 }
  0xe4   :  { %383 = vrot.lane.b32.xlu1 %v129_v27, %s1988_s17  ;;  %134 = vrot.lane.b32.xlu0 %v129_v27, %s1989_s18  ;;  %v140_v29 = vsel %vm69_vm0, %v129_v27, 0 }
  0xe5   :  { %1696 = vmatpush3.bf16.xpose.msra.mxu0 %v140_v29  ;;  %v120_v30 = vpop.f32.mrb[4].mxu0 }
  0xe6   :  { %v121_v31 = vadd.f32 %v120_v30, %v42_v17  ;;  %v122_v32 = vpop.f32.mrb[5].mxu0  ;;  %1707 = vmatprep.subr.bf16.mxu0 %v1986_v11 }
  0xe7   :  { %v123_v33 = vadd.f32 %v122_v32, %v46_v19  ;;  %v124_v34 = vpop.f32.mrb[6].mxu0 }
  0xe8   :  { %381 = vrot.lane.b32.xlu1 %v130_v28, %s1990_s3  ;;  %257 = vrot.lane.b32.xlu0 %v129_v27, %s1990_s3  ;;  %v125_v35 = vadd.f32 %v124_v34, %v42_v17  ;;  %v126_v36 = vpop.f32.mrb[7].mxu0 }
  0xe9   :  { %v127_v37 = vadd.f32 %v126_v36, %v46_v19 }
  0xea   :  { %v131_v38 = vpack.c.bf16 %v125_v35, %v121_v31 }
  0xeb   :  { %v132_v39 = vpack.c.bf16 %v127_v37, %v123_v33 }
  0xec   :  { %659 = vrot.lane.b32.xlu1 %v131_v38, %s1990_s3  ;;  %539 = vrot.lane.b32.xlu0 %v131_v38, %s1989_s18  ;;  %v545_v46 = vsel %vm69_vm0, %v131_v38, 0 }
  0xf0   :  { %780 = vrot.lane.b32.xlu1 %v132_v39, %s1990_s3  ;;  %782 = vrot.lane.b32.xlu0 %v131_v38, %s1988_s17 }
 0x156   :  { %v135_v40 = vpop.permute.xlu0 %134  ;;  %v384_v43 = vpop.permute.xlu1 %383 }
 0x157   :  { %1698 = vmatmul.mubr.msk.bf16.vlgmr.msra.gmra.mrb[8].mxu0 %vm69_vm0, %v135_v40  ;;  %v389_v44 = vsel %vm69_vm0, %v384_v43, 0 }
 0x158   :  { %1709 = vmatprep.mubr.msk.bf16.mxu0 %vm1987_vm1, %v1986_v11 }
 0x15a   :  { %v258_v41 = vpop.permute.xlu0 %257  ;;  %v382_v45 = vpop.permute.xlu1 %381 }
 0x15b   :  { %v263_v42 = vsel %vm69_vm0, %v258_v41, 0 }
 0x15c   :  { %1708 = vmatpush3.bf16.xpose.msra.mxu0 %v263_v42 }
 0x15d   :  { %1719 = vmatprep.subr.bf16.mxu0 %v1986_v11 }
 0x15e   :  { %v660_v47 = vpop.permute.xlu1 %659  ;;  %v540_v49 = vpop.permute.xlu0 %539 }
 0x15f   :  { %v665_v48 = vsel %vm69_vm0, %v660_v47, 0 }
 0x162   :  { %v783_v50 = vpop.permute.xlu0 %782  ;;  %v781_v52 = vpop.permute.xlu1 %780 }
 0x163   :  { %1710 = vmatmul.mubr.msk.bf16.vlgmr.msra.gmra.mrb[12].mxu0 %vm69_vm0, %v130_v28  ;;  %v788_v51 = vsel %vm69_vm0, %v783_v50, 0 }
 0x164   :  { %1720 = vmatpush3.bf16.xpose.msra.mxu0 %v389_v44  ;;  %1721 = vmatprep.mubr.msk.bf16.mxu0 %vm1987_vm1, %v1986_v11 }
 0x165   :  { %1731 = vmatprep.subr.bf16.mxu0 %v1986_v11 }
 0x16b   :  { %1722 = vmatmul.mubr.msk.bf16.vlgmr.msra.gmra.mrb[16].mxu0 %vm69_vm0, %v382_v45 }
 0x16c   :  { %1732 = vmatpush3.bf16.xpose.msra.mxu0 %v545_v46  ;;  %1733 = vmatprep.mubr.msk.bf16.mxu0 %vm1987_vm1, %v1986_v11 }
 0x16d   :  { %1743 = vmatprep.subr.bf16.mxu0 %v1986_v11 }
 0x173   :  { %1734 = vmatmul.mubr.msk.bf16.vlgmr.msra.gmra.mrb[20].mxu0 %vm69_vm0, %v540_v49 }
 0x174   :  { %1744 = vmatpush3.bf16.xpose.msra.mxu0 %v665_v48  ;;  %1745 = vmatprep.mubr.msk.bf16.mxu0 %vm1987_vm1, %v1986_v11 }
 0x175   :  { %1755 = vmatprep.subr.bf16.mxu0 %v1986_v11 }
 0x17b   :  { %1746 = vmatmul.mubr.msk.bf16.vlgmr.msra.gmra.mrb[24].mxu0 %vm69_vm0, %v132_v39 }
 0x17c   :  { %1756 = vmatpush3.bf16.xpose.msra.mxu0 %v788_v51  ;;  %1757 = vmatprep.mubr.msk.bf16.mxu0 %vm1987_vm1, %v1986_v11 }
 0x183   :  { %1758 = vmatmul.mubr.msk.bf16.vlgmr.msra.gmra.mrb[28].mxu0 %vm69_vm0, %v781_v52 }
 0x22a   :  { %v176_v53 = vpop.f32.mrb[8].mxu0 }
 0x22b   :  { %v183_v54 = vmul.f32 0.03125, %v176_v53  ;;  %v1699_v55 = vpop.f32.mrb[9].mxu0 }
 0x22c   :  { %v179_v56 = vpop.f32.mrb[10].mxu0 }
 0x22d   :  { %v184_v57 = vmul.f32 0.03125, %v179_v56  ;;  %v1700_v58 = vpop.f32.mrb[11].mxu0  ;;  %v186_v59 = vsel %vm185_vm2, %v183_v54, -inf }
 0x22e   :  { %187 = vmax.xlane.f32.xlu0 %v186_v59 }
 0x22f   :  { %v189_v60 = vsel %vm185_vm2, %v184_v57, -inf }
 0x230   :  { %190 = vmax.xlane.f32.xlu1 %v189_v60 }
 0x236   :  { %v299_v61 = vpop.f32.mrb[12].mxu0 }
 0x237   :  { %v306_v62 = vmul.f32 0.03125, %v299_v61  ;;  %v1711_v63 = vpop.f32.mrb[13].mxu0 }
 0x238   :  { %v302_v0 = vpop.f32.mrb[14].mxu0 }
 0x239   :  { %v2123_v1 = vmul.f32 0.03125, %v302_v0  ;;  %v1712_v2 = vpop.f32.mrb[15].mxu0  ;;  %v308_v3 = vsel %vm185_vm2, %v306_v62, -inf }
 0x23a   :  { %309 = vmax.xlane.f32.xlu0 %v308_v3 }
 0x23b   :  { %v311_v4 = vsel %vm185_vm2, %v2123_v1, -inf }
 0x23e   :  { %312 = vmax.xlane.f32.xlu0 %v311_v4  ;;  %v425_v12 = vpop.f32.mrb[16].mxu0 }
 0x23f   :  { %v2128_v13 = vmul.f32 0.03125, %v425_v12  ;;  %v1723_v14 = vpop.f32.mrb[17].mxu0 }
 0x240   :  { %v428_v15 = vpop.f32.mrb[18].mxu0 }
 0x241   :  { %v2130_v16 = vmul.f32 0.03125, %v428_v15  ;;  %v1724_v17 = vpop.f32.mrb[19].mxu0  ;;  %v434_v18 = vsel %vm185_vm2, %v2128_v13, -inf }
 0x242   :  { %435 = vmax.xlane.f32.xlu1 %v434_v18 }
 0x243   :  { %v437_v19 = vsel %vm185_vm2, %v2130_v16, -inf }
 0x244   :  { %438 = vmax.xlane.f32.xlu0 %v437_v19 }
 0x246   :  { %v581_v20 = vpop.f32.mrb[20].mxu0 }
 0x247   :  { %v2136_v21 = vmul.f32 0.03125, %v581_v20  ;;  %v1735_v22 = vpop.f32.mrb[21].mxu0 }
 0x248   :  { %v584_v23 = vpop.f32.mrb[22].mxu0 }
 0x249   :  { %v2138_v24 = vmul.f32 0.03125, %v584_v23  ;;  %v1736_v25 = vpop.f32.mrb[23].mxu0  ;;  %v590_v26 = vsel %vm185_vm2, %v2136_v21, -inf }
 0x24a   :  { %591 = vmax.xlane.f32.xlu1 %v590_v26 }
 0x24b   :  { %v593_v27 = vsel %vm185_vm2, %v2138_v24, -inf }
 0x24c   :  { %594 = vmax.xlane.f32.xlu0 %v593_v27 }
 0x24e   :  { %v701_v28 = vpop.f32.mrb[24].mxu0 }
 0x24f   :  { %v2144_v29 = vmul.f32 0.03125, %v701_v28  ;;  %v1747_v30 = vpop.f32.mrb[25].mxu0 }
 0x250   :  { %v704_v31 = vpop.f32.mrb[26].mxu0 }
 0x251   :  { %v2146_v32 = vmul.f32 0.03125, %v704_v31  ;;  %v1748_v33 = vpop.f32.mrb[27].mxu0  ;;  %v710_v34 = vsel %vm185_vm2, %v2144_v29, -inf }
 0x252   :  { %711 = vmax.xlane.f32.xlu1 %v710_v34 }
 0x253   :  { %v713_v35 = vsel %vm185_vm2, %v2146_v32, -inf }
 0x254   :  { %714 = vmax.xlane.f32.xlu0 %v713_v35 }
 0x256   :  { %v824_v36 = vpop.f32.mrb[28].mxu0 }
 0x257   :  { %v2152_v37 = vmul.f32 0.03125, %v824_v36  ;;  %v1759_v38 = vpop.f32.mrb[29].mxu0 }
 0x258   :  { %v827_v39 = vpop.f32.mrb[30].mxu0 }
 0x259   :  { %v2154_v40 = vmul.f32 0.03125, %v827_v39  ;;  %v1760_v41 = vpop.f32.mrb[31].mxu0  ;;  %v833_v42 = vsel %vm185_vm2, %v2152_v37, -inf }
 0x25a   :  { %834 = vmax.xlane.f32.xlu1 %v833_v42 }
 0x25b   :  { %v836_v43 = vsel %vm185_vm2, %v2154_v40, -inf }
 0x25c   :  { %837 = vmax.xlane.f32.xlu0 %v836_v43 }
 0x2bb   :  { %v188_v44 = vpop.xlane.xlu0 %187 }
 0x2bc   :  { %v192_v45 = vsub.f32 %v183_v54, %v188_v44 }
 0x2bd   :  { %v191_v46 = vpop.xlane.xlu1 %190 }
 0x2be   :  { %v194_v47 = vmul.f32 1.442695, %v192_v45  ;;  %v193_v48 = vsub.f32 %v184_v57, %v191_v46 }
 0x2c0   :  { %1937 = vpow2.f32 %v194_v47  ;;  %v196_v49 = vmul.f32 1.442695, %v193_v48 }
 0x2c2   :  { %1939 = vpow2.f32 %v196_v49 }
 0x2c7   :  { %v310_v50 = vpop.xlane.xlu0 %309 }
 0x2c8   :  { %v314_v51 = vsub.f32 %v306_v62, %v310_v50 }
 0x2ca   :  { %v2160_v52 = vpop.eup %1937  ;;  %v316_v53 = vmul.f32 1.442695, %v314_v51 }
 0x2cb   :  { %v313_v55 = vpop.xlane.xlu0 %312  ;;  %v198_v56 = vsel %vm185_vm2, %v2160_v52, 0.0 }
 0x2cc   :  { %v2164_v58 = vpop.eup %1939  ;;  %1941 = vpow2.f32 %v316_v53  ;;  %v315_v54 = vsub.f32 %v2123_v1, %v313_v55  ;;  %199 = vadd.xlane.f32.xlu1 %v198_v56  ;;  %v208_v55 = vld [vmem:[%s2459_s1] sm:$0xff]  ;;  %v209_v56 = vld [vmem:[%s2459_s1 + $0x8] sm:$0xff] }
 0x2cd   :  { %v201_v57 = vsel %vm185_vm2, %v2164_v58, 0.0 }
 0x2ce   :  { %v318_v59 = vmul.f32 1.442695, %v315_v54  ;;  %202 = vadd.xlane.f32.xlu0 %v201_v57 }
 0x2cf   :  { %v436_v60 = vpop.xlane.xlu1 %435 }
 0x2d0   :  { %1943 = vpow2.f32 %v318_v59  ;;  %v440_v61 = vsub.f32 %v2128_v13, %v436_v60 }
 0x2d1   :  { %v439_v62 = vpop.xlane.xlu0 %438 }
 0x2d2   :  { %v442_v63 = vmul.f32 1.442695, %v440_v61  ;;  %v441_v0 = vsub.f32 %v2130_v16, %v439_v62 }
 0x2d4   :  { %1945 = vpow2.f32 %v442_v63  ;;  %v444_v2 = vmul.f32 1.442695, %v441_v0 }
 0x2d6   :  { %v2171_v3 = vpop.eup %1941  ;;  %1947 = vpow2.f32 %v444_v2  ;;  %v1570_v2 = vld [vmem:[%s2459_s1 + $0x10] sm:$0xff] }
 0x2d7   :  { %v592_v1 = vpop.xlane.xlu1 %591  ;;  %v320_v4 = vsel %vm185_vm2, %v2171_v3, 0.0 }
 0x2d8   :  { %v596_v12 = vsub.f32 %v2136_v21, %v592_v1  ;;  %321 = vadd.xlane.f32.xlu1 %v320_v4  ;;  %v1571_v1 = vld [vmem:[%s2459_s1 + $0x18] sm:$0xff] }
 0x2d9   :  { %v595_v14 = vpop.xlane.xlu0 %594 }
 0x2da   :  { %v2176_v15 = vpop.eup %1943  ;;  %v598_v13 = vmul.f32 1.442695, %v596_v12  ;;  %v597_v17 = vsub.f32 %v2138_v24, %v595_v14 }
 0x2db   :  { %v323_v16 = vsel %vm185_vm2, %v2176_v15, 0.0 }
 0x2dc   :  { %1949 = vpow2.f32 %v598_v13  ;;  %v600_v18 = vmul.f32 1.442695, %v597_v17  ;;  %324 = vadd.xlane.f32.xlu0 %v323_v16 }
 0x2de   :  { %v2181_v19 = vpop.eup %1945  ;;  %1951 = vpow2.f32 %v600_v18 }
 0x2df   :  { %v712_v20 = vpop.xlane.xlu1 %711  ;;  %v446_v21 = vsel %vm185_vm2, %v2181_v19, 0.0 }
 0x2e0   :  { %v2185_v22 = vpop.eup %1947  ;;  %v716_v23 = vsub.f32 %v2144_v29, %v712_v20  ;;  %447 = vadd.xlane.f32.xlu1 %v446_v21  ;;  %v1575_v20 = vld [vmem:[%s2459_s1 + $0x28] sm:$0xff] }
 0x2e1   :  { %v715_v25 = vpop.xlane.xlu0 %714  ;;  %v449_v24 = vsel %vm185_vm2, %v2185_v22, 0.0 }
 0x2e2   :  { %v718_v26 = vmul.f32 1.442695, %v716_v23  ;;  %v717_v27 = vsub.f32 %v2146_v32, %v715_v25  ;;  %450 = vadd.xlane.f32.xlu0 %v449_v24 }
 0x2e4   :  { %1953 = vpow2.f32 %v718_v26  ;;  %v720_v28 = vmul.f32 1.442695, %v717_v27 }
 0x2e6   :  { %v2191_v30 = vpop.eup %1949  ;;  %1955 = vpow2.f32 %v720_v28 }
 0x2e7   :  { %v835_v31 = vpop.xlane.xlu1 %834  ;;  %v602_v33 = vsel %vm185_vm2, %v2191_v30, 0.0 }
 0x2e8   :  { %v2195_v34 = vpop.eup %1951  ;;  %v839_v29 = vsub.f32 %v2152_v37, %v835_v31  ;;  %603 = vadd.xlane.f32.xlu1 %v602_v33 }
 0x2e9   :  { %v838_v35 = vpop.xlane.xlu0 %837  ;;  %v605_v36 = vsel %vm185_vm2, %v2195_v34, 0.0 }
 0x2ea   :  { %v841_v32 = vmul.f32 1.442695, %v839_v29  ;;  %v840_v38 = vsub.f32 %v2154_v40, %v838_v35  ;;  %606 = vadd.xlane.f32.xlu0 %v605_v36 }
 0x2ec   :  { %1957 = vpow2.f32 %v841_v32  ;;  %v843_v39 = vmul.f32 1.442695, %v840_v38 }
 0x2ee   :  { %v2201_v41 = vpop.eup %1953  ;;  %1959 = vpow2.f32 %v843_v39 }
 0x2ef   :  { %v722_v42 = vsel %vm185_vm2, %v2201_v41, 0.0 }
 0x2f0   :  { %v2205_v43 = vpop.eup %1955  ;;  %723 = vadd.xlane.f32.xlu1 %v722_v42 }
 0x2f1   :  { %v725_v37 = vsel %vm185_vm2, %v2205_v43, 0.0 }
 0x2f2   :  { %726 = vadd.xlane.f32.xlu0 %v725_v37 }
 0x2f6   :  { %v2209_v44 = vpop.eup %1957 }
 0x2f7   :  { %v845_v40 = vsel %vm185_vm2, %v2209_v44, 0.0 }
 0x2f8   :  { %v2213_v45 = vpop.eup %1959  ;;  %846 = vadd.xlane.f32.xlu1 %v845_v40 }
 0x2f9   :  { %v848_v46 = vsel %vm185_vm2, %v2213_v45, 0.0 }
 0x2fa   :  { %849 = vadd.xlane.f32.xlu0 %v848_v46 }
 0x359   :  { %v200_v47 = vpop.xlane.xlu1 %199 }
 0x35a   :  { %1961 = vrcp.f32 %v200_v47 }
 0x35b   :  { %v203_v48 = vpop.xlane.xlu0 %202 }
 0x35c   :  { %1963 = vrcp.f32 %v203_v48 }
 0x364   :  { %v1962_v49 = vpop.eup %1961 }
 0x365   :  { %v322_v50 = vpop.xlane.xlu1 %321  ;;  %v206_v51 = vmul.f32 %v1962_v49, %v2160_v52 }
 0x366   :  { %v1964_v53 = vpop.eup %1963  ;;  %1965 = vrcp.f32 %v322_v50 }
 0x367   :  { %v207_v54 = vmul.f32 %v1964_v53, %v2164_v58  ;;  %v210_v59 = vadd.f32 %v208_v55, %v206_v51 }
 0x369   :  { %v325_v57 = vpop.xlane.xlu0 %324  ;;  %v211_v60 = vadd.f32 %v209_v56, %v207_v54 }
 0x36a   :  { %1967 = vrcp.f32 %v325_v57 }
 0x36b   :  { %v212_v61 = vpack.c.bf16 %v211_v60, %v210_v59 }
 0x36d   :  { %v448_v62 = vpop.xlane.xlu1 %447  ;;  %1704 = vmatmul.mubr.msk.bf16.vlgmr.msra.gmra.mrb[0].mxu1 %vm185_vm2, %v212_v61 }
 0x36e   :  { %1969 = vrcp.f32 %v448_v62  ;;  %1714 = vmatpush3.bf16.msra.mxu1 %v2055_v7  ;;  %1715 = vmatprep.mubr.msk.bf16.mxu1 %vm1987_vm1, %v1986_v11  ;;  %v1904_v62 = vld [vmem:[%s2460_s4 + $0x18] sm:$0xff]  }
 0x36f   :  { %v451_v52 = vpop.xlane.xlu0 %450  ;;  %1725 = vmatprep.subr.bf16.mxu1 %v1986_v11 }
 0x370   :  { %v1966_v63 = vpop.eup %1965  ;;  %1971 = vrcp.f32 %v451_v52 }
 0x371   :  { %v328_v58 = vmul.f32 %v1966_v63, %v2171_v3 }
 0x373   :  { %v333_v14 = vadd.f32 %v1570_v2, %v328_v58 }
 0x374   :  { %v1968_v0 = vpop.eup %1967 }
 0x375   :  { %v329_v4 = vmul.f32 %v1968_v0, %v2176_v15  ;;  %v604_v12 = vpop.xlane.xlu1 %603  ;;  %v1574_v15 = vld [vmem:[%s2459_s1 + $0x20] sm:$0xff] }
 0x376   :  { %1973 = vrcp.f32 %v604_v12  ;;  %v1905_v0 = vld [vmem:[%s2460_s4 + $0x20] sm:$0xff]  }
 0x377   :  { %v334_v13 = vadd.f32 %v1571_v1, %v329_v4  ;;  %v607_v17 = vpop.xlane.xlu0 %606  ;;  %v1906_v4 = vld [vmem:[%s2460_s4 + $0x28] sm:$0xff]  }
 0x378   :  { %v1970_v16 = vpop.eup %1969  ;;  %1975 = vrcp.f32 %v607_v17  ;;  %v1907_v17 = vld [vmem:[%s2460_s4 + $0x30] sm:$0xff]  }
 0x379   :  { %v335_v18 = vpack.c.bf16 %v334_v13, %v333_v14  ;;  %v454_v21 = vmul.f32 %v1970_v16, %v2181_v19 }
 0x37a   :  { %v1972_v3 = vpop.eup %1971 }
 0x37b   :  { %v455_v23 = vmul.f32 %v1972_v3, %v2185_v22  ;;  %1716 = vmatmul.mubr.msk.bf16.vlgmr.msra.gmra.mrb[4].mxu1 %vm185_vm2, %v335_v18  ;;  %v459_v26 = vadd.f32 %v1574_v15, %v454_v21  ;;  %v1908_v3 = vld [vmem:[%s2460_s4 + $0x38] sm:$0xff]  }
 0x37c   :  { %1726 = vmatpush3.bf16.msra.mxu1 %v2055_v7  ;;  %1727 = vmatprep.mubr.msk.bf16.mxu1 %vm1987_vm1, %v1986_v11 }
 0x37d   :  { %v460_v25 = vadd.f32 %v1575_v20, %v455_v23  ;;  %v724_v24 = vpop.xlane.xlu1 %723  ;;  %1737 = vmatprep.subr.bf16.mxu1 %v1986_v11 }
 0x37e   :  { %1977 = vrcp.f32 %v724_v24  ;;  %v1909_v24 = vld [vmem:[%s2460_s4 + $0x40] sm:$0xff]  }
 0x37f   :  { %v727_v19 = vpop.xlane.xlu0 %726  ;;  %v461_v22 = vpack.c.bf16 %v460_v25, %v459_v26  ;;  %v1910_v26 = vld [vmem:[%s2460_s4 + $0x48] sm:$0xff]  }
 0x380   :  { %v1974_v27 = vpop.eup %1973  ;;  %1979 = vrcp.f32 %v727_v19 }
 0x381   :  { %v610_v31 = vmul.f32 %v1974_v27, %v2191_v30 }
 0x382   :  { %v1976_v28 = vpop.eup %1975 }
 0x383   :  { %v611_v33 = vmul.f32 %v1976_v28, %v2195_v34  ;;  %1728 = vmatmul.mubr.msk.bf16.vlgmr.msra.gmra.mrb[8].mxu1 %vm185_vm2, %v461_v22  ;;  %v612_v35 = vadd.f32 %v610_v31, %v208_v55  ;;  %v1911_v22 = vld [vmem:[%s2460_s4 + $0x50] sm:$0xff]  }
 0x384   :  { %1738 = vmatpush3.bf16.msra.mxu1 %v2071_v10  ;;  %1739 = vmatprep.mubr.msk.bf16.mxu1 %vm1987_vm1, %v1986_v11 }
 0x385   :  { %v613_v7 = vadd.f32 %v611_v33, %v209_v56  ;;  %v847_v29 = vpop.xlane.xlu1 %846  ;;  %1749 = vmatprep.subr.bf16.mxu1 %v1986_v11 }
 0x386   :  { %1981 = vrcp.f32 %v847_v29  ;;  %v1913_v29 = vld [vmem:[%s2460_s4 + $0x60] sm:$0xff]  }
 0x387   :  { %v850_v36 = vpop.xlane.xlu0 %849  ;;  %v614_v38 = vpack.c.bf16 %v613_v7, %v612_v35  ;;  %v1912_v7 = vld [vmem:[%s2460_s4 + $0x58] sm:$0xff]   ;;  %v1914_v35 = vld [vmem:[%s2460_s4 + $0x68] sm:$0xff]  }
 0x388   :  { %v1978_v32 = vpop.eup %1977  ;;  %1983 = vrcp.f32 %v850_v36 }
 0x389   :  { %v730_v34 = vmul.f32 %v1978_v32, %v2201_v41 }
 0x38a   :  { %v1980_v30 = vpop.eup %1979 }
 0x38b   :  { %v731_v39 = vmul.f32 %v1980_v30, %v2205_v43  ;;  %1740 = vmatmul.mubr.msk.bf16.vlgmr.msra.gmra.mrb[12].mxu1 %vm185_vm2, %v614_v38  ;;  %v732_v37 = vadd.f32 %v1570_v2, %v730_v34 }
 0x38c   :  { %1750 = vmatpush3.bf16.msra.mxu1 %v2071_v10  ;;  %1751 = vmatprep.mubr.msk.bf16.mxu1 %vm1987_vm1, %v1986_v11 }
 0x38d   :  { %v733_v42 = vadd.f32 %v1571_v1, %v731_v39  ;;  %1761 = vmatprep.subr.bf16.mxu1 %v1986_v11 }
 0x38f   :  { %v734_v46 = vpack.c.bf16 %v733_v42, %v732_v37 }
 0x390   :  { %v1982_v40 = vpop.eup %1981 }
 0x391   :  { %v853_v48 = vmul.f32 %v1982_v40, %v2209_v44  ;;  %v1901_v44 = vld [vmem:[%s2460_s4] sm:$0xff]  }
 0x392   :  { %v1984_v47 = vpop.eup %1983  ;;  %1767 = vmatprep.subr.bf16.mxu0 %v1901_v44 }
 0x393   :  { %v854_v41 = vmul.f32 %v1984_v47, %v2213_v45  ;;  %1752 = vmatmul.mubr.msk.bf16.vlgmr.msra.gmra.mrb[16].mxu1 %vm185_vm2, %v734_v46  ;;  %v855_v49 = vadd.f32 %v1574_v15, %v853_v48  ;;  %1768 = vmatpush3.bf16.msra.mxu0 %v1901_v44  ;;  %v1903_v45 = vld [vmem:[%s2460_s4 + $0x10] sm:$0xff]  }
 0x394   :  { %1762 = vmatpush3.bf16.msra.mxu1 %v2071_v10  ;;  %1763 = vmatprep.mubr.msk.bf16.mxu1 %vm1987_vm1, %v1986_v11  ;;  %v1902_v10 = vld [vmem:[%s2460_s4 + $0x8] sm:$0xff]  }
 0x395   :  { %v856_v43 = vadd.f32 %v1575_v20, %v854_v41  ;;  %1769 = vmatprep.subr.bf16.mxu0 %v1902_v10  ;;  %1787 = vmatprep.subr.bf16.mxu1 %v1909_v24 }
 0x397   :  { %v857_v50 = vpack.c.bf16 %v856_v43, %v855_v49  ;;  %1770 = vmatpush3.bf16.msra.mxu0 %v1902_v10 }
 0x398   :  { %1771 = vmatprep.subr.bf16.mxu0 %v1903_v45 }
 0x39b   :  { %1764 = vmatmul.mubr.msk.bf16.vlgmr.msra.gmra.mrb[20].mxu1 %vm185_vm2, %v857_v50  ;;  %1772 = vmatpush3.bf16.msra.mxu0 %v1903_v45 }
 0x39c   :  { %1773 = vmatprep.subr.bf16.mxu0 %v1904_v62  ;;  %1788 = vmatpush3.bf16.msra.mxu1 %v1909_v24  ;;  %v1921_v24 = vld [vmem:[%s2461_s5 + $0x20] sm:$0xff]  }
 0x39d   :  { %1789 = vmatprep.subr.bf16.mxu1 %v1910_v26 }
 0x39f   :  { %1774 = vmatpush3.bf16.msra.mxu0 %v1904_v62 }
 0x3a0   :  { %1775 = vmatprep.subr.bf16.mxu0 %v1905_v0  ;;  %1790 = vmatpush3.bf16.msra.mxu1 %v1910_v26  ;;  %v1922_v26 = vld [vmem:[%s2461_s5 + $0x28] sm:$0xff]  }
 0x3a1   :  { %1791 = vmatprep.subr.bf16.mxu1 %v1911_v22 }
 0x3a3   :  { %1776 = vmatpush3.bf16.msra.mxu0 %v1905_v0  ;;  %v1920_v0 = vld [vmem:[%s2461_s5 + $0x18] sm:$0xff]  }
 0x3a4   :  { %1777 = vmatprep.subr.bf16.mxu0 %v1906_v4  ;;  %1792 = vmatpush3.bf16.msra.mxu1 %v1911_v22  ;;  %v1925_v22 = vld [vmem:[%s2460_s4 + $0x80] sm:$0xff]  }
 0x3a5   :  { %1793 = vmatprep.subr.bf16.mxu1 %v1912_v7 }
 0x3a7   :  { %1778 = vmatpush3.bf16.msra.mxu0 %v1906_v4 }
 0x3a8   :  { %1779 = vmatprep.subr.bf16.mxu0 %v1907_v17  ;;  %1794 = vmatpush3.bf16.msra.mxu1 %v1912_v7 }
 0x3a9   :  { %1795 = vmatprep.subr.bf16.mxu1 %v1913_v29 }
 0x3ab   :  { %1780 = vmatpush3.bf16.msra.mxu0 %v1907_v17 }
 0x3ac   :  { %1781 = vmatprep.subr.bf16.mxu0 %v1908_v3  ;;  %1796 = vmatpush3.bf16.msra.mxu1 %v1913_v29 }
 0x3ad   :  { %1797 = vmatprep.subr.bf16.mxu1 %v1914_v35 }
 0x3af   :  { %1782 = vmatpush3.bf16.msra.mxu0 %v1908_v3 }
 0x3b0   :  { %1798 = vmatpush3.bf16.msra.mxu1 %v1914_v35 }
 0x440   :  { %v250_v51 = vpop.f32.mrb[0].mxu1 }
 0x441   :  { %v1705_v53 = vpop.f32.mrb[1].mxu1 }
 0x442   :  { %v253_v55 = vpop.f32.mrb[2].mxu1 }
 0x443   :  { %v1865_v56 = vpack.i.bf16 %v253_v55, %v250_v51  ;;  %v1706_v54 = vpop.f32.mrb[3].mxu1 }
 0x445   :  { %1866 = vrot.lane.b32.xlu1 %v1865_v56, %s1989_s18 }
 0x44e   :  { %v373_v11 = vpop.f32.mrb[4].mxu1 }
 0x44f   :  { %v1717_v57 = vpop.f32.mrb[5].mxu1 }
 0x450   :  { %v376_v59 = vpop.f32.mrb[6].mxu1 }
 0x451   :  { %v1870_v60 = vpack.i.bf16 %v376_v59, %v373_v11  ;;  %v1718_v61 = vpop.f32.mrb[7].mxu1 }
 0x453   :  { %1871 = vrot.lane.b32.xlu0 %v1870_v60, %s1988_s17 }
 0x456   :  { %v499_v52 = vpop.f32.mrb[8].mxu1 }
 0x457   :  { %v1729_v63 = vpop.f32.mrb[9].mxu1 }
 0x458   :  { %v502_v58 = vpop.f32.mrb[10].mxu1  ;;  %v1918_v63 = vld [vmem:[%s2461_s5 + $0x8] sm:$0xff]  }
 0x459   :  { %v1875_v2 = vpack.i.bf16 %v502_v58, %v499_v52  ;;  %v1730_v1 = vpop.f32.mrb[11].mxu1  ;;  %v1915_v52 = vld [vmem:[%s2460_s4 + $0x70] sm:$0xff]  }
 0x45a   :  { %1799 = vmatprep.subr.bf16.mxu1 %v1915_v52  ;;  %v1919_v58 = vld [vmem:[%s2461_s5 + $0x10] sm:$0xff]  }
 0x45b   :  { %1876 = vrot.lane.b32.xlu1 %v1875_v2, %s1990_s3  ;;  %1800 = vmatpush3.bf16.msra.mxu1 %v1915_v52  ;;  %v1583_v2 = vld [vmem:[%s2462_s6] ss:$0 sm:$0xff] }
 0x45e   :  { %v652_v12 = vpop.f32.mrb[12].mxu1 }
 0x45f   :  { %v1741_v14 = vpop.f32.mrb[13].mxu1 }
 0x460   :  { %v655_v13 = vpop.f32.mrb[14].mxu1 }
 0x461   :  { %v1880_v16 = vpack.i.bf16 %v655_v13, %v652_v12  ;;  %v1742_v18 = vpop.f32.mrb[15].mxu1 }
 0x463   :  { %1881 = vrot.lane.b32.xlu1 %v1880_v16, %s1989_s18 }
 0x466   :  { %v772_v20 = vpop.f32.mrb[16].mxu1 }
 0x467   :  { %v1753_v21 = vpop.f32.mrb[17].mxu1 }
 0x468   :  { %v775_v23 = vpop.f32.mrb[18].mxu1 }
 0x469   :  { %v1885_v15 = vpack.i.bf16 %v775_v23, %v772_v20  ;;  %v1754_v25 = vpop.f32.mrb[19].mxu1 }
 0x46b   :  { %1886 = vrot.lane.b32.xlu0 %v1885_v15, %s1988_s17 }
 0x46e   :  { %v895_v19 = vpop.f32.mrb[20].mxu1 }
 0x46f   :  { %v1765_v27 = vpop.f32.mrb[21].mxu1 }
 0x470   :  { %v898_v28 = vpop.f32.mrb[22].mxu1  ;;  %v1924_v27 = vld [vmem:[%s2461_s5 + $0x38] sm:$0xff]  }
 0x471   :  { %v1890_v31 = vpack.i.bf16 %v898_v28, %v895_v19  ;;  %v1766_v33 = vpop.f32.mrb[23].mxu1  ;;  %v1923_v19 = vld [vmem:[%s2461_s5 + $0x30] sm:$0xff]   ;;  %v1926_v28 = vld [vmem:[%s2460_s4 + $0x88] sm:$0xff]  }
 0x472   :  { %v1592_v33 = vld [vmem:[%s2462_s6 + $0x1] ss:$0 sm:$0xff] }
 0x473   :  { %1891 = vrot.lane.b32.xlu1 %v1890_v31, %s1990_s3  ;;  %v1927_v31 = vld [vmem:[%s2460_s4 + $0x90] sm:$0xff]  }
 0x4b7   :  { %v1867_v36 = vpop.permute.xlu1 %1866 }
 0x4b8   :  { %v1869_v38 = vunpack.i.h.bf16 %v1867_v36  ;;  %v1868_v30 = vunpack.i.l.bf16 %v1867_v36 }
 0x4ba   :  { %v531_v37 = vsel %vm69_vm0, %v2051_v6, %v1869_v38  ;;  %v530_v40 = vsel %vm69_vm0, %v2046_v5, %v1868_v30 }
 0x4c5   :  { %v1872_v32 = vpop.permute.xlu0 %1871 }
 0x4c6   :  { %v1874_v34 = vunpack.i.h.bf16 %v1872_v32  ;;  %v1873_v39 = vunpack.i.l.bf16 %v1872_v32 }
 0x4c8   :  { %v534_v48 = vsel %vm532_vm3, %v531_v37, %v1874_v34  ;;  %v533_v41 = vsel %vm532_vm3, %v530_v40, %v1873_v39 }
 0x4cd   :  { %v1877_v42 = vpop.permute.xlu1 %1876 }
 0x4ce   :  { %v1879_v46 = vunpack.i.h.bf16 %v1877_v42  ;;  %v1878_v47 = vunpack.i.l.bf16 %v1877_v42 }
 0x4d0   :  { %v536_v43 = vsel %vm535_vm4, %v533_v41, %v1878_v47  ;;  %v537_v49 = vsel %vm535_vm4, %v534_v48, %v1879_v46 }
 0x4d1   :  { %v932_v50 = vpack.c.bf16 %v537_v49, %v536_v43 }
 0x4d3   :  { %1783 = vmatprep.mubr.bf16.mxu0 %v932_v50 }
 0x4d5   :  { %v1882_v51 = vpop.permute.xlu1 %1881 }
 0x4d6   :  { %v1884_v55 = vunpack.i.h.bf16 %v1882_v51  ;;  %v1883_v56 = vunpack.i.l.bf16 %v1882_v51 }
 0x4d8   :  { %v927_v5 = vsel %vm69_vm0, %v2067_v9, %v1884_v55  ;;  %v926_v10 = vsel %vm69_vm0, %v2062_v8, %v1883_v56  ;;  %v1916_v8 = vld [vmem:[%s2460_s4 + $0x78] sm:$0xff]   ;;  %v1917_v9 = vld [vmem:[%s2461_s5] sm:$0xff]  }
 0x4d9   :  { %1801 = vmatprep.subr.bf16.mxu1 %v1916_v8  ;;  %1807 = vmatprep.subr.bf16.mxu0 %v1917_v9 }
 0x4da   :  { %1802 = vmatpush3.bf16.msra.mxu1 %v1916_v8 }
 0x4db   :  { %1827 = vmatprep.subr.bf16.mxu1 %v1925_v22 }
 0x4dd   :  { %v1887_v53 = vpop.permute.xlu0 %1886 }
 0x4de   :  { %v1889_v6 = vunpack.i.h.bf16 %v1887_v53  ;;  %v1888_v54 = vunpack.i.l.bf16 %v1887_v53 }
 0x4e0   :  { %v929_v57 = vsel %vm532_vm3, %v927_v5, %v1889_v6  ;;  %v928_v59 = vsel %vm532_vm3, %v926_v10, %v1888_v54 }
 0x4e5   :  { %v1892_v44 = vpop.permute.xlu1 %1891 }
 0x4e6   :  { %v1894_v11 = vunpack.i.h.bf16 %v1892_v44  ;;  %v1893_v45 = vunpack.i.l.bf16 %v1892_v44 }
 0x4e8   :  { %v930_v60 = vsel %vm535_vm4, %v928_v59, %v1893_v45  ;;  %v931_v61 = vsel %vm535_vm4, %v929_v57, %v1894_v11  ;;  %v1928_v57 = vld [vmem:[%s2460_s4 + $0x98] sm:$0xff]   ;;  %v1929_v59 = vld [vmem:[%s2460_s4 + $0xa0] sm:$0xff]  }
 0x4e9   :  { %v933_v62 = vpack.c.bf16 %v931_v61, %v930_v60 }
 0x4eb   :  { %1784 = vmatmul.mubr.bf16.vlgmr.msra.gmra.mrb[32].mxu0 %v933_v62 }
 0x4ec   :  { %1808 = vmatpush3.bf16.msra.mxu0 %v1917_v9 }
 0x4ed   :  { %1809 = vmatprep.subr.bf16.mxu0 %v1918_v63 }
 0x4f0   :  { %1810 = vmatpush3.bf16.msra.mxu0 %v1918_v63  ;;  %v1930_v63 = vld [vmem:[%s2460_s4 + $0xa8] sm:$0xff]  }
 0x4f1   :  { %1811 = vmatprep.subr.bf16.mxu0 %v1919_v58 }
 0x4f4   :  { %1812 = vmatpush3.bf16.msra.mxu0 %v1919_v58  ;;  %v1931_v58 = vld [vmem:[%s2460_s4 + $0xb0] sm:$0xff]  }
 0x4f5   :  { %1813 = vmatprep.subr.bf16.mxu0 %v1920_v0 }
 0x4f8   :  { %1814 = vmatpush3.bf16.msra.mxu0 %v1920_v0  ;;  %v1932_v0 = vld [vmem:[%s2460_s4 + $0xb8] sm:$0xff]  }
 0x4f9   :  { %1815 = vmatprep.subr.bf16.mxu0 %v1921_v24 }
 0x4fc   :  { %1816 = vmatpush3.bf16.msra.mxu0 %v1921_v24 }
 0x4fd   :  { %1817 = vmatprep.subr.bf16.mxu0 %v1922_v26 }
 0x500   :  { %1818 = vmatpush3.bf16.msra.mxu0 %v1922_v26 }
 0x501   :  { %1819 = vmatprep.subr.bf16.mxu0 %v1923_v19 }
 0x504   :  { %1820 = vmatpush3.bf16.msra.mxu0 %v1923_v19 }
 0x505   :  { %1821 = vmatprep.subr.bf16.mxu0 %v1924_v27 }
 0x508   :  { %1822 = vmatpush3.bf16.msra.mxu0 %v1924_v27 }
 0x5be   :  { %v1785_v1 = vpop.f32.mrb[32].mxu0 }
 0x5bf   :  { %v1037_v4 = vpop.f32.mrb[33].mxu0  ;;  %v2359_v13 = vadd.f32 %v1785_v1, %v1583_v2  ;;  %v1934_v1 = vld [vmem:[%s2460_s4 + $0xc8] sm:$0xff]  }
 0x5c0   :  { %v2357_v12 = vadd.f32 %v1583_v2, %v1037_v4  ;;  %v1786_v14 = vpop.f32.mrb[34].mxu0  ;;  %v1935_v4 = vld [vmem:[%s2460_s4 + $0xd0] sm:$0xff]  }
 0x5c1   :  { %v2361_v17 = vadd.f32 %v1786_v14, %v1583_v2  ;;  %v1040_v16 = vpop.f32.mrb[35].mxu0  ;;  %v1054_v23 = vmax.f32 %v2359_v13, 0.0  ;;  %v1936_v14 = vld [vmem:[%s2460_s4 + $0xd8] sm:$0xff]  }
 0x5c2   :  { %v2363_v18 = vadd.f32 %v1583_v2, %v1040_v16  ;;  %v1052_v20 = vmax.f32 %v2357_v12, 0.0  ;;  %v1933_v2 = vld [vmem:[%s2460_s4 + $0xc0] sm:$0xff]  }
 0x5c3   :  { %v1055_v3 = vmax.f32 %v2361_v17, 0.0  ;;  %v1609_v16 = vld [vmem:[%s2462_s6 + $0x2] ss:$0 sm:$0xff] }
 0x5c4   :  { %v1053_v21 = vmax.f32 %v2363_v18, 0.0 }
 0x5c5   :  { %v1057_v25 = vpack.c.bf16 %v1055_v3, %v1054_v23 }
 0x5c6   :  { %v1056_v15 = vpack.c.bf16 %v1053_v21, %v1052_v20 }
 0x5c8   :  { %1803 = vmatprep.mubr.bf16.mxu1 %v1056_v15 }
 0x5c9   :  { %1804 = vmatmul.mubr.bf16.vlgmr.msra.gmra.mrb[24].mxu1 %v1057_v25 }
 0x5ca   :  { %1828 = vmatpush3.bf16.msra.mxu1 %v1925_v22 }
 0x5cb   :  { %1829 = vmatprep.subr.bf16.mxu1 %v1926_v28 }
 0x5ce   :  { %1830 = vmatpush3.bf16.msra.mxu1 %v1926_v28 }
 0x5cf   :  { %1831 = vmatprep.subr.bf16.mxu1 %v1927_v31 }
 0x5d2   :  { %1832 = vmatpush3.bf16.msra.mxu1 %v1927_v31 }
 0x5d3   :  { %1833 = vmatprep.subr.bf16.mxu1 %v1928_v57 }
 0x5d6   :  { %1834 = vmatpush3.bf16.msra.mxu1 %v1928_v57 }
 0x5d7   :  { %1839 = vmatprep.subr.bf16.mxu1 %v1929_v59 }
 0x69c   :  { %v1805_v7 = vpop.f32.mrb[24].mxu1 }
 0x69d   :  { %v1170_v29 = vadd.f32 %v1805_v7, %v1592_v33  ;;  %v1161_v35 = vpop.f32.mrb[25].mxu1 }
 0x69e   :  { %v1162_v36 = vadd.f32 %v1592_v33, %v1161_v35  ;;  %v1806_v32 = vpop.f32.mrb[26].mxu1 }
 0x69f   :  { %v1178_v38 = vadd.f32 3.0, %v1170_v29  ;;  %v1173_v30 = vadd.f32 %v1806_v32, %v1592_v33  ;;  %v1164_v34 = vpop.f32.mrb[27].mxu1 }
 0x6a0   :  { %v1176_v39 = vadd.f32 3.0, %v1162_v36  ;;  %v1165_v42 = vadd.f32 %v1592_v33, %v1164_v34 }
 0x6a1   :  { %v1182_v37 = vmax.f32 %v1178_v38, 0.0  ;;  %v1179_v40 = vadd.f32 3.0, %v1173_v30 }
 0x6a2   :  { %v1180_v46 = vmax.f32 %v1176_v39, 0.0  ;;  %v1177_v47 = vadd.f32 3.0, %v1165_v42 }
 0x6a3   :  { %v1186_v48 = vmin.f32 %v1182_v37, 6.0  ;;  %v1183_v41 = vmax.f32 %v1179_v40, 0.0 }
 0x6a4   :  { %v1184_v43 = vmin.f32 %v1180_v46, 6.0  ;;  %v1181_v49 = vmax.f32 %v1177_v47, 0.0 }
 0x6a5   :  { %v1190_v50 = vmul.f32 %v1186_v48, %v1170_v29  ;;  %v1187_v51 = vmin.f32 %v1183_v41, 6.0 }
 0x6a6   :  { %v1188_v53 = vmul.f32 %v1184_v43, %v1162_v36  ;;  %v1185_v55 = vmin.f32 %v1181_v49, 6.0 }
 0x6a7   :  { %v1191_v56 = vmul.f32 %v1187_v51, %v1173_v30  ;;  %v1194_v54 = vmul.f32 0.16666667, %v1190_v50 }
 0x6a8   :  { %v1189_v6 = vmul.f32 %v1185_v55, %v1165_v42  ;;  %v1192_v5 = vmul.f32 0.16666667, %v1188_v53  ;;  %v1616_v53 = vld [vmem:[%s2462_s6 + $0x3] ss:$0 sm:$0xff] }
 0x6a9   :  { %v1195_v44 = vmul.f32 0.16666667, %v1191_v56 }
 0x6aa   :  { %v1193_v10 = vmul.f32 0.16666667, %v1189_v6 }
 0x6ab   :  { %v1197_v11 = vpack.c.bf16 %v1195_v44, %v1194_v54 }
 0x6ac   :  { %v1196_v45 = vpack.c.bf16 %v1193_v10, %v1192_v5 }
 0x6ae   :  { %1823 = vmatprep.mubr.bf16.mxu0 %v1196_v45 }
 0x6af   :  { %1824 = vmatmul.mubr.bf16.vlgmr.msra.gmra.mrb[36].mxu0 %v1197_v11 }
 0x782   :  { %v1825_v60 = vpop.f32.mrb[36].mxu0 }
 0x783   :  { %v1296_v61 = vpop.f32.mrb[37].mxu0 }
 0x784   :  { %v1826_v62 = vpop.f32.mrb[38].mxu0 }
 0x785   :  { %v1312_v52 = vpack.c.bf16 %v1826_v62, %v1825_v60  ;;  %v1299_v8 = vpop.f32.mrb[39].mxu0 }
 0x786   :  { %v1311_v9 = vpack.c.bf16 %v1299_v8, %v1296_v61 }
 0x788   :  { %1835 = vmatprep.mubr.msk.bf16.mxu1 %vm532_vm3, %v1311_v9 }
 0x789   :  { %1836 = vmatmul.mubr.msk.bf16.vlgmr.msra.gmra.mrb[28].mxu1 %vm532_vm3, %v1312_v52 }
 0x78a   :  { %1840 = vmatpush3.bf16.msra.mxu1 %v1929_v59 }
 0x78b   :  { %1841 = vmatprep.subr.bf16.mxu1 %v1930_v63 }
 0x78e   :  { %1842 = vmatpush3.bf16.msra.mxu1 %v1930_v63 }
 0x78f   :  { %1843 = vmatprep.subr.bf16.mxu1 %v1931_v58 }
 0x792   :  { %1844 = vmatpush3.bf16.msra.mxu1 %v1931_v58 }
 0x793   :  { %1845 = vmatprep.subr.bf16.mxu1 %v1932_v0 }
 0x796   :  { %1846 = vmatpush3.bf16.msra.mxu1 %v1932_v0 }
 0x797   :  { %1847 = vmatprep.subr.bf16.mxu1 %v1933_v2 }
 0x79a   :  { %1848 = vmatpush3.bf16.msra.mxu1 %v1933_v2 }
 0x79b   :  { %1849 = vmatprep.subr.bf16.mxu1 %v1934_v1 }
 0x79e   :  { %1850 = vmatpush3.bf16.msra.mxu1 %v1934_v1 }
 0x79f   :  { %1851 = vmatprep.subr.bf16.mxu1 %v1935_v4 }
 0x7a2   :  { %1852 = vmatpush3.bf16.msra.mxu1 %v1935_v4 }
 0x7a3   :  { %1853 = vmatprep.subr.bf16.mxu1 %v1936_v14 }
 0x7a6   :  { %1854 = vmatpush3.bf16.msra.mxu1 %v1936_v14 }
 0x85c   :  { %v1837_v15 = vpop.f32.mrb[28].mxu1 }
 0x85d   :  { %v1399_v25 = vadd.f32 %v1837_v15, %v1609_v16  ;;  %v1390_v24 = vpop.f32.mrb[29].mxu1 }
 0x85e   :  { %v1391_v26 = vadd.f32 %v1609_v16, %v1390_v24  ;;  %v1838_v19 = vpop.f32.mrb[30].mxu1 }
 0x85f   :  { %v1407_v27 = vadd.f32 3.0, %v1399_v25  ;;  %v1402_v22 = vadd.f32 %v1838_v19, %v1609_v16  ;;  %v1393_v28 = vpop.f32.mrb[31].mxu1 }
 0x860   :  { %v1405_v31 = vadd.f32 3.0, %v1391_v26  ;;  %v1394_v33 = vadd.f32 %v1609_v16, %v1393_v28 }
 0x861   :  { %v1411_v7 = vmax.f32 %v1407_v27, 0.0  ;;  %v1408_v29 = vadd.f32 3.0, %v1402_v22 }
 0x862   :  { %v1409_v35 = vmax.f32 %v1405_v31, 0.0  ;;  %v1406_v36 = vadd.f32 3.0, %v1394_v33 }
 0x863   :  { %v1415_v32 = vmin.f32 %v1411_v7, 6.0  ;;  %v1412_v38 = vmax.f32 %v1408_v29, 0.0 }
 0x864   :  { %v1413_v30 = vmin.f32 %v1409_v35, 6.0  ;;  %v1410_v34 = vmax.f32 %v1406_v36, 0.0 }
 0x865   :  { %v1419_v39 = vmul.f32 %v1415_v32, %v1399_v25  ;;  %v1416_v42 = vmin.f32 %v1412_v38, 6.0 }
 0x866   :  { %v1417_v37 = vmul.f32 %v1413_v30, %v1391_v26  ;;  %v1414_v40 = vmin.f32 %v1410_v34, 6.0 }
 0x867   :  { %v1420_v46 = vmul.f32 %v1416_v42, %v1402_v22  ;;  %v1423_v48 = vmul.f32 0.16666667, %v1419_v39 }
 0x868   :  { %v1418_v47 = vmul.f32 %v1414_v40, %v1394_v33  ;;  %v1421_v43 = vmul.f32 0.16666667, %v1417_v37 }
 0x869   :  { %v1424_v41 = vmul.f32 0.16666667, %v1420_v46 }
 0x86a   :  { %v1422_v49 = vmul.f32 0.16666667, %v1418_v47 }
 0x86b   :  { %v1426_v50 = vpack.c.bf16 %v1424_v41, %v1423_v48 }
 0x86c   :  { %v1425_v51 = vpack.c.bf16 %v1422_v49, %v1421_v43 }
 0x86e   :  { %1855 = vmatprep.mubr.bf16.mxu1 %v1425_v51 }
 0x86f   :  { %1856 = vmatmul.mubr.bf16.vlgmr.msra.gmra.mrb[32].mxu1 %v1426_v50 }
 0x942   :  { %v1857_v55 = vpop.f32.mrb[32].mxu1 }
 0x943   :  { %v1539_v56 = vadd.f32 %v1857_v55, %v1616_v53  ;;  %v1530_v6 = vpop.f32.mrb[33].mxu1 }
 0x944   :  { %v1531_v54 = vadd.f32 %v1616_v53, %v1530_v6  ;;  %v1858_v44 = vpop.f32.mrb[34].mxu1 }
 0x945   :  { %v1547_v5 = vadd.f32 %v1539_v56, %v1054_v23  ;;  %v1542_v10 = vadd.f32 %v1858_v44, %v1616_v53  ;;  %v1533_v11 = vpop.f32.mrb[35].mxu1 }
 0x946   :  { %v1545_v45 = vadd.f32 %v1531_v54, %v1052_v20  ;;  %v1534_v57 = vadd.f32 %v1616_v53, %v1533_v11 }
 0x947   :  { %v1551_v59 = vmax.f32 %v1547_v5, 0.0  ;;  %v1548_v60 = vadd.f32 %v1542_v10, %v1055_v3 }
 0x948   :  { %v1549_v61 = vmax.f32 %v1545_v45, 0.0  ;;  %v1546_v62 = vadd.f32 %v1534_v57, %v1053_v21 }
 0x949   :  { %1555 = vst [vmem:[%s2463_s7 + $0x10] sm:$0xff] %v1551_v59  ;;  %v1552_v13 = vmax.f32 %v1548_v60, 0.0 }
 0x94a   :  { %1553 = vst [vmem:[%s2463_s7] sm:$0xff] %v1549_v61  ;;  %v1550_v12 = vmax.f32 %v1546_v62, 0.0 }
 0x94b   :  { %1556 = vst [vmem:[%s2463_s7 + $0x18] sm:$0xff] %v1552_v13 }
 0x94c   :  { %1554 = vst [vmem:[%s2463_s7 + $0x8] sm:$0xff] %v1550_v12 }

</bundles_post_ra>
